<compile_context>
chip_gen: v6e
topology: v6e:2x2x1
jax: 0.10.0
libtpu: 0.0.40
codegen_flags: <defaults>
</compile_context>

<pallas_src>
import math
import numpy as np

import jax
import jax.numpy as jnp
from jax import lax
from jax.experimental import pallas as pl
from jax.experimental.pallas import tpu as pltpu


_LANE = 128
_VMEM_LIMIT = 48 * 1024 * 1024   # stays under v7x's 64 MiB physical VMEM


def _round_up(x, m):
    return (x + m - 1) // m * m


# ----------------------------------------------------------------------------
# Log-polar bin mask (host-side constant)
# ----------------------------------------------------------------------------
def build_logpolar_mask(kernel_size=5, num_levels=2, ang_levels=6, facbase=2):
    """mask[b, dy, dx] = 1/count_b if window offset (dy,dx) belongs to log-polar
    bin b (b = level * ang_levels + angle); centre pixel excluded."""
    c = kernel_size // 2
    rmax = c * math.sqrt(2.0)
    assign = -np.ones((kernel_size, kernel_size), dtype=np.int64)
    for dy in range(kernel_size):
        for dx in range(kernel_size):
            oy, ox = dy - c, dx - c
            if oy == 0 and ox == 0:
                continue
            r = math.hypot(oy, ox)
            level = num_levels - 1
            for l in range(num_levels):
                if r <= rmax / (facbase ** (num_levels - 1 - l)):
                    level = l
                    break
            theta = math.atan2(oy, ox) % (2.0 * math.pi)
            ang = min(int(theta / (2.0 * math.pi / ang_levels)), ang_levels - 1)
            assign[dy, dx] = level * ang_levels + ang
    nbins = num_levels * ang_levels
    mask = np.zeros((nbins, kernel_size, kernel_size), dtype=np.float32)
    for b in range(nbins):
        sel = assign == b
        cnt = int(sel.sum())
        if cnt > 0:
            mask[b][sel] = 1.0 / cnt
    return mask


_MASK = build_logpolar_mask()
_NBINS = _MASK.shape[0]                       # 12
# Per-bin list of (dy, dx, 1/count) taps, baked into the kernel as constants.
_BIN_TAPS = [
    [(dy, dx, float(_MASK[b, dy, dx]))
     for dy in range(5) for dx in range(5) if _MASK[b, dy, dx] != 0.0]
    for b in range(_NBINS)
]


# ----------------------------------------------------------------------------
# Fully fused kernel (one image per grid step)
# ----------------------------------------------------------------------------
def _make_fused_kernel(H, W, Wf, Mc, Mcp, Cp, CoutP):
    """Wf: frame row width = round_up(W+4, 8) so compaction slices are 8-aligned.
    Mc = H*W compact rows, Mcp = Mc rounded up to 8."""
    L = (H - 1) * Wf + W            # rows each tap slice must cover

    def kernel(x_ref, w1_ref, w2_ref, w3_ref,
               s1_ref, b1_ref, s2_ref, b2_ref, s3_ref, b3_ref,
               o_ref, frame_ref):
        # ---- stage 1: conv1 (1x1) + BN1 + ReLU (f32 accumulate) ----------------
        xb = x_ref[...]                                             # (Mcp, CinP) bf16
        out1 = jnp.dot(xb, w1_ref[...], preferred_element_type=jnp.float32)
        out1 = jnp.maximum(out1 * s1_ref[...] + b1_ref[...], 0.0)   # (Mcp, Cp) f32

        # ---- build the 2-px-halo wide frame in VMEM (f32) ----------------------
        frame_ref[...] = jnp.zeros_like(frame_ref)
        for h in range(H):
            frame_ref[pl.ds((h + 2) * Wf + 2, W), :] = out1[h * W:(h + 1) * W, :]

        # ---- log-polar pooling: 12 bins (VPU adds) + centre tap ----------------
        streams = []
        for taps in _BIN_TAPS:
            acc = None
            for (dy, dx, wt) in taps:
                term = frame_ref[pl.ds(dy * Wf + dx, L), :] * wt
                acc = term if acc is None else acc + term
            streams.append(acc)
        streams.append(frame_ref[pl.ds(2 * Wf + 2, L), :])          # centerconv2 input

        pooled_w = jnp.concatenate(streams, axis=-1)                # (L, 13*Cp) f32
        # compact: drop the halo/garbage columns before anything touches the MXU
        pooled = jnp.concatenate(
            [pooled_w[h * Wf:h * Wf + W, :] for h in range(H)],
            axis=0).astype(jnp.bfloat16)                            # (Mc, 13*Cp)

        # ---- stage 2: ONE matmul, K = 13*Cp (conv2 over bins + centerconv2) ----
        h2 = jnp.dot(pooled, w2_ref[...], preferred_element_type=jnp.float32)
        h2 = jnp.maximum(h2 * s2_ref[...] + b2_ref[...], 0.0).astype(jnp.bfloat16)

        # ---- stage 3: conv3 (1x1) + BN3 + residual + ReLU ----------------------
        out3 = jnp.dot(h2, w3_ref[...], preferred_element_type=jnp.float32)
        res = xb[:Mc, :].astype(jnp.float32)                        # CinP == CoutP
        out = jnp.maximum(out3 * s3_ref[...] + b3_ref[...] + res, 0.0)
        if Mcp != Mc:
            out = jnp.concatenate(
                [out, jnp.zeros((Mcp - Mc, CoutP), out.dtype)], axis=0)
        o_ref[...] = out

    return kernel


# ----------------------------------------------------------------------------
# Parameters (deterministic init; shapes from BottleneckLogS.__init__)
# ----------------------------------------------------------------------------
def init_params(key, inplanes, planes):
    ks = jax.random.split(key, 8)

    def nrm(k, shape, scale=0.1):
        return scale * jax.random.normal(k, shape, dtype=jnp.float32)

    def bn_init(k, c):
        k1, k2, k3, k4 = jax.random.split(k, 4)
        return dict(gamma=1.0 + 0.1 * jax.random.normal(k1, (c,), jnp.float32),
                    beta=0.1 * jax.random.normal(k2, (c,), jnp.float32),
                    mean=0.1 * jax.random.normal(k3, (c,), jnp.float32),
                    var=0.5 + jax.random.uniform(k4, (c,), jnp.float32))

    return {
        'w1': nrm(ks[0], (planes, inplanes)),          # conv1 1x1, (O, I)
        'w2': nrm(ks[1], (planes, planes, 4, 3)),      # conv2, OIHW
        'wc': nrm(ks[2], (planes, planes)),            # centerconv2 1x1, (O, I)
        'bc': nrm(ks[3], (planes,)),                   # centerconv2 bias
        'w3': nrm(ks[4], (planes * 4, planes)),        # conv3 1x1, (O, I)
        'bn1': bn_init(ks[5], planes),
        'bn2': bn_init(ks[6], planes),
        'bn3': bn_init(ks[7], planes * 4),
    }


def fold_params(params, eps=1e-5):
    """Precompute (once, outside the forward path) folded / padded / bf16 weights."""
    planes, inplanes = params['w1'].shape
    cout = planes * 4
    Cp = _round_up(planes, _LANE)
    CinP = _round_up(inplanes, _LANE)
    CoutP = _round_up(cout, _LANE)

    def bn_fold(bn):
        sc = bn['gamma'] / jnp.sqrt(bn['var'] + eps)
        sh = bn['beta'] - bn['mean'] * sc
        return sc, sh

    s1, b1 = bn_fold(params['bn1'])
    s2, b2 = bn_fold(params['bn2'])
    s3, b3 = bn_fold(params['bn3'])
    b2 = b2 + params['bc'] * s2                         # centerconv2 bias into BN2 shift

    # conv1: (O, I) -> (I, O), channel-padded, bf16
    w1 = jnp.pad(params['w1'].T,
                 ((0, CinP - inplanes), (0, Cp - planes))).astype(jnp.bfloat16)

    # Stage-2 weight: stacked [12 bin weights of conv2 ; centerconv2], each (I, O),
    # giving a single (13*Cp, Cp) matrix.  conv2 kernel tap (r, c) of the (4, 3)
    # kernel corresponds to log-polar bin b = r*3 + c (level-major rows, angle cols).
    w2b = params['w2'].reshape(planes, planes, _NBINS)  # (O, I, bin)
    mats = [jnp.pad(w2b[:, :, b].T, ((0, Cp - planes), (0, Cp - planes)))
            for b in range(_NBINS)]
    mats.append(jnp.pad(params['wc'].T, ((0, Cp - planes), (0, Cp - planes))))
    w2big = jnp.concatenate(mats, axis=0).astype(jnp.bfloat16)      # (13*Cp, Cp)

    # conv3: (O, I) -> (I, O), padded, bf16
    w3 = jnp.pad(params['w3'].T,
                 ((0, Cp - planes), (0, CoutP - cout))).astype(jnp.bfloat16)

    def padc(v, P):
        return jnp.pad(v.astype(jnp.float32), (0, P - v.shape[0])).reshape(1, P)

    return {
        'w1': w1, 's1': padc(s1, Cp), 'b1': padc(b1, Cp),
        'w2': w2big, 's2': padc(s2, Cp), 'b2': padc(b2, Cp),
        'w3': w3, 's3': padc(s3, CoutP), 'b3': padc(b3, CoutP),
        'planes': planes, 'cout': cout,
    }


# ----------------------------------------------------------------------------
# Forward pass (Pallas path)
# ----------------------------------------------------------------------------
def bottleneck_logs_forward(x_nchw, fp, stride=1):
    N, Cin, H, W = x_nchw.shape
    cout = fp['cout']
    assert stride == 1 and Cin == cout, "no-downsample configuration expected"

    CinP, Cp = fp['w1'].shape
    CoutP = fp['w3'].shape[1]
    assert CinP == CoutP, "residual add requires matching padded channel count"

    Wf = _round_up(W + 4, 8)            # frame row width (8-aligned compaction)
    Mc = H * W
    Mcp = _round_up(Mc, 8)
    frame_rows = (H + 4) * Wf           # multiple of 8 since Wf is

    # NCHW -> N(HW)C, channel-pad to 128, bf16 (single XLA pass; also the residual)
    x_rows = jnp.transpose(x_nchw, (0, 2, 3, 1)).reshape(N, Mc, Cin)
    x_rows = jnp.pad(x_rows, ((0, 0), (0, Mcp - Mc), (0, CinP - Cin))).astype(jnp.bfloat16)

    kernel = _make_fused_kernel(H, W, Wf, Mc, Mcp, Cp, CoutP)
    Kbig = fp['w2'].shape[0]            # 13 * Cp

    out = pl.pallas_call(
        kernel,
        out_shape=jax.ShapeDtypeStruct((N, Mcp, CoutP), jnp.float32),
        grid=(N,),
        in_specs=[
            pl.BlockSpec((None, Mcp, CinP), lambda n: (n, 0, 0)),   # x (conv1 in + residual)
            pl.BlockSpec((CinP, Cp), lambda n: (0, 0)),             # w1
            pl.BlockSpec((Kbig, Cp), lambda n: (0, 0)),             # w2 (bins + centre)
            pl.BlockSpec((Cp, CoutP), lambda n: (0, 0)),            # w3
            pl.BlockSpec((1, Cp), lambda n: (0, 0)),                # s1
            pl.BlockSpec((1, Cp), lambda n: (0, 0)),                # b1
            pl.BlockSpec((1, Cp), lambda n: (0, 0)),                # s2
            pl.BlockSpec((1, Cp), lambda n: (0, 0)),                # b2
            pl.BlockSpec((1, CoutP), lambda n: (0, 0)),             # s3
            pl.BlockSpec((1, CoutP), lambda n: (0, 0)),             # b3
        ],
        out_specs=pl.BlockSpec((None, Mcp, CoutP), lambda n: (n, 0, 0)),
        scratch_shapes=[pltpu.VMEM((frame_rows, Cp), jnp.float32)],
        compiler_params=pltpu.CompilerParams(
            dimension_semantics=("parallel",),
            vmem_limit_bytes=_VMEM_LIMIT),
    )(x_rows, fp['w1'], fp['w2'], fp['w3'],
      fp['s1'], fp['b1'], fp['s2'], fp['b2'], fp['s3'], fp['b3'])

    out = out[:, :Mc, :cout].reshape(N, H, W, cout)
    return jnp.transpose(out, (0, 3, 1, 2))             # back to NCHW


# ----------------------------------------------------------------------------
# Pure-JAX reference mirroring the PyTorch module structure (for verification)
# ----------------------------------------------------------------------------
def reference_forward(x_nchw, params, stride=1, eps=1e-5):
    def bn_apply(y, bn):
        sc = bn['gamma'] / jnp.sqrt(bn['var'] + eps)
        sh = bn['beta'] - bn['mean'] * sc
        return y * sc[None, :, None, None] + sh[None, :, None, None]

    mask = jnp.asarray(_MASK)
    s = stride

    out = jnp.einsum('nchw,oc->nohw', x_nchw, params['w1'])          # conv1
    out = jax.nn.relu(bn_apply(out, params['bn1']))

    N, C, H, W = out.shape
    Ho = (H + 4 - 5) // s + 1
    Wo = (W + 4 - 5) // s + 1
    xp = jnp.pad(out, ((0, 0), (0, 0), (2, 2), (2, 2)))
    patches = jnp.stack(
        [xp[:, :, dy:dy + (Ho - 1) * s + 1:s, dx:dx + (Wo - 1) * s + 1:s]
         for dy in range(5) for dx in range(5)], axis=-1)            # (N, C, Ho, Wo, 25)
    pooled = jnp.einsum('nchwk,bk->nchwb', patches, mask.reshape(12, 25))
    tiled = pooled.reshape(N, C, Ho, Wo, 4, 3)
    tiled = jnp.transpose(tiled, (0, 1, 2, 4, 3, 5)).reshape(N, C, Ho * 4, Wo * 3)

    out2 = lax.conv_general_dilated(tiled, params['w2'], window_strides=(4, 3),
                                    padding='VALID',
                                    dimension_numbers=('NCHW', 'OIHW', 'NCHW'))
    centers = out[:, :, ::s, ::s]
    outc = jnp.einsum('nchw,oc->nohw', centers, params['wc']) + params['bc'][None, :, None, None]
    out = jax.nn.relu(bn_apply(out2 + outc, params['bn2']))

    out = jnp.einsum('nchw,oc->nohw', out, params['w3'])
    out = bn_apply(out, params['bn3'])
    out = out + x_nchw
    return jax.nn.relu(out)


# ----------------------------------------------------------------------------
if __name__ == "__main__":
    key = jax.random.PRNGKey(0)
    kx, kp = jax.random.split(key)

    planes = 4
    inplanes = planes * 4          # residual add with downsample=None requires this
    N, H, W = 2, 8, 8

    x = jax.random.normal(kx, (N, inplanes, H, W), dtype=jnp.float32)
    params = init_params(kp, inplanes, planes)
    fp = fold_params(params)       # folded / padded once, outside the forward path

    fwd = jax.jit(lambda a: bottleneck_logs_forward(a, fp, stride=1))
    out = jax.block_until_ready(fwd(x))
    assert out.shape == (N, 4 * planes, H, W)

    ref = reference_forward(x, params, stride=1)
    err = float(jnp.max(jnp.abs(out - ref)))
    if err < 5e-2:
        print("KERNEL_OK")
    else:
        print(f"MISMATCH max_abs_err={err}")
</pallas_src>

<mosaic_0001>
module attributes {stable_mosaic.version = 11 : i64} {
  func.func @kernel(%arg0: i32, %arg1: memref<1x64x128xbf16, #tpu.memory_space<vmem>>, %arg2: memref<128x128xbf16, #tpu.memory_space<vmem>>, %arg3: memref<1664x128xbf16, #tpu.memory_space<vmem>>, %arg4: memref<128x128xbf16, #tpu.memory_space<vmem>>, %arg5: memref<1x128xf32, #tpu.memory_space<vmem>>, %arg6: memref<1x128xf32, #tpu.memory_space<vmem>>, %arg7: memref<1x128xf32, #tpu.memory_space<vmem>>, %arg8: memref<1x128xf32, #tpu.memory_space<vmem>>, %arg9: memref<1x128xf32, #tpu.memory_space<vmem>>, %arg10: memref<1x128xf32, #tpu.memory_space<vmem>>, %arg11: memref<1x64x128xf32, #tpu.memory_space<vmem>>, %arg12: memref<192x128xf32, #tpu.memory_space<vmem>>) attributes {dimension_semantics = [#tpu.dimension_semantics<parallel>], iteration_bounds = array<i64: 2>, scalar_prefetch = 0 : i64, scratch_operands = 1 : i64, tpu.core_type = #tpu.core_type<tc>, window_params = [{transform_indices = @transform_0, window_bounds = array<i64: 1, 64, 128>}, {pipeline_mode = #tpu.pipeline_mode<synchronous>, transform_indices = @transform_1, window_bounds = array<i64: 128, 128>}, {pipeline_mode = #tpu.pipeline_mode<synchronous>, transform_indices = @transform_2, window_bounds = array<i64: 1664, 128>}, {pipeline_mode = #tpu.pipeline_mode<synchronous>, transform_indices = @transform_3, window_bounds = array<i64: 128, 128>}, {pipeline_mode = #tpu.pipeline_mode<synchronous>, transform_indices = @transform_4, window_bounds = array<i64: 1, 128>}, {pipeline_mode = #tpu.pipeline_mode<synchronous>, transform_indices = @transform_5, window_bounds = array<i64: 1, 128>}, {pipeline_mode = #tpu.pipeline_mode<synchronous>, transform_indices = @transform_6, window_bounds = array<i64: 1, 128>}, {pipeline_mode = #tpu.pipeline_mode<synchronous>, transform_indices = @transform_7, window_bounds = array<i64: 1, 128>}, {pipeline_mode = #tpu.pipeline_mode<synchronous>, transform_indices = @transform_8, window_bounds = array<i64: 1, 128>}, {pipeline_mode = #tpu.pipeline_mode<synchronous>, transform_indices = @transform_9, window_bounds = array<i64: 1, 128>}, {transform_indices = @transform_10, window_bounds = array<i64: 1, 64, 128>}]} {
    %c0 = arith.constant 0 : index
    %c0_0 = arith.constant 0 : index
    %c0_1 = arith.constant 0 : index
    %0 = vector.load %arg1[%c0, %c0_0, %c0_1] : memref<1x64x128xbf16, #tpu.memory_space<vmem>>, vector<1x64x128xbf16>
    %1 = vector.shape_cast %0 : vector<1x64x128xbf16> to vector<64x128xbf16>
    %c0_2 = arith.constant 0 : index
    %c0_3 = arith.constant 0 : index
    %2 = vector.load %arg2[%c0_2, %c0_3] : memref<128x128xbf16, #tpu.memory_space<vmem>>, vector<128x128xbf16>
    %cst = arith.constant dense<0.000000e+00> : vector<64x128xf32>
    %3 = tpu.matmul %1, %2, %cst {dimension_numbers = #tpu.dot_dimension_numbers<[1], [0], [0], [1], [0, 0, 1, 1], [], []>} : vector<64x128xbf16>, vector<128x128xbf16>, vector<64x128xf32> -> vector<64x128xf32>
    %c0_4 = arith.constant 0 : index
    %c0_5 = arith.constant 0 : index
    %4 = vector.load %arg5[%c0_4, %c0_5] : memref<1x128xf32, #tpu.memory_space<vmem>>, vector<1x128xf32>
    %5 = vector.broadcast %4 : vector<1x128xf32> to vector<64x128xf32>
    %6 = arith.mulf %3, %5 : vector<64x128xf32>
    %c0_6 = arith.constant 0 : index
    %c0_7 = arith.constant 0 : index
    %7 = vector.load %arg6[%c0_6, %c0_7] : memref<1x128xf32, #tpu.memory_space<vmem>>, vector<1x128xf32>
    %8 = vector.broadcast %7 : vector<1x128xf32> to vector<64x128xf32>
    %9 = arith.addf %6, %8 : vector<64x128xf32>
    %cst_8 = arith.constant 0.000000e+00 : f32
    %10 = vector.broadcast %cst_8 : f32 to vector<64x128xf32>
    %11 = arith.maximumf %9, %10 : vector<64x128xf32>
    %cst_9 = arith.constant 0.000000e+00 : f32
    %12 = vector.broadcast %cst_9 : f32 to vector<192x128xf32>
    %c0_10 = arith.constant 0 : index
    %c0_11 = arith.constant 0 : index
    %13 = vector.load %arg12[%c0_10, %c0_11] : memref<192x128xf32, #tpu.memory_space<vmem>>, vector<192x128xf32>
    tpu.vector_store %arg12[%c0_10, %c0_11], %12 {strides = array<i32>} : memref<192x128xf32, #tpu.memory_space<vmem>>, vector<192x128xf32>,
    %14 = vector.extract_strided_slice %11 {offsets = [0, 0], sizes = [8, 128], strides = [1, 1]} : vector<64x128xf32> to vector<8x128xf32>
    %c34 = arith.constant 34 : index
    %c0_12 = arith.constant 0 : index
    %15 = vector.load %arg12[%c34, %c0_12] : memref<192x128xf32, #tpu.memory_space<vmem>>, vector<8x128xf32>
    tpu.vector_store %arg12[%c34, %c0_12], %14 {strides = array<i32>} : memref<192x128xf32, #tpu.memory_space<vmem>>, vector<8x128xf32>,
    %16 = vector.extract_strided_slice %11 {offsets = [8, 0], sizes = [8, 128], strides = [1, 1]} : vector<64x128xf32> to vector<8x128xf32>
    %c50 = arith.constant 50 : index
    %c0_13 = arith.constant 0 : index
    %17 = vector.load %arg12[%c50, %c0_13] : memref<192x128xf32, #tpu.memory_space<vmem>>, vector<8x128xf32>
    tpu.vector_store %arg12[%c50, %c0_13], %16 {strides = array<i32>} : memref<192x128xf32, #tpu.memory_space<vmem>>, vector<8x128xf32>,
    %18 = vector.extract_strided_slice %11 {offsets = [16, 0], sizes = [8, 128], strides = [1, 1]} : vector<64x128xf32> to vector<8x128xf32>
    %c66 = arith.constant 66 : index
    %c0_14 = arith.constant 0 : index
    %19 = vector.load %arg12[%c66, %c0_14] : memref<192x128xf32, #tpu.memory_space<vmem>>, vector<8x128xf32>
    tpu.vector_store %arg12[%c66, %c0_14], %18 {strides = array<i32>} : memref<192x128xf32, #tpu.memory_space<vmem>>, vector<8x128xf32>,
    %20 = vector.extract_strided_slice %11 {offsets = [24, 0], sizes = [8, 128], strides = [1, 1]} : vector<64x128xf32> to vector<8x128xf32>
    %c82 = arith.constant 82 : index
    %c0_15 = arith.constant 0 : index
    %21 = vector.load %arg12[%c82, %c0_15] : memref<192x128xf32, #tpu.memory_space<vmem>>, vector<8x128xf32>
    tpu.vector_store %arg12[%c82, %c0_15], %20 {strides = array<i32>} : memref<192x128xf32, #tpu.memory_space<vmem>>, vector<8x128xf32>,
    %22 = vector.extract_strided_slice %11 {offsets = [32, 0], sizes = [8, 128], strides = [1, 1]} : vector<64x128xf32> to vector<8x128xf32>
    %c98 = arith.constant 98 : index
    %c0_16 = arith.constant 0 : index
    %23 = vector.load %arg12[%c98, %c0_16] : memref<192x128xf32, #tpu.memory_space<vmem>>, vector<8x128xf32>
    tpu.vector_store %arg12[%c98, %c0_16], %22 {strides = array<i32>} : memref<192x128xf32, #tpu.memory_space<vmem>>, vector<8x128xf32>,
    %24 = vector.extract_strided_slice %11 {offsets = [40, 0], sizes = [8, 128], strides = [1, 1]} : vector<64x128xf32> to vector<8x128xf32>
    %c114 = arith.constant 114 : index
    %c0_17 = arith.constant 0 : index
    %25 = vector.load %arg12[%c114, %c0_17] : memref<192x128xf32, #tpu.memory_space<vmem>>, vector<8x128xf32>
    tpu.vector_store %arg12[%c114, %c0_17], %24 {strides = array<i32>} : memref<192x128xf32, #tpu.memory_space<vmem>>, vector<8x128xf32>,
    %26 = vector.extract_strided_slice %11 {offsets = [48, 0], sizes = [8, 128], strides = [1, 1]} : vector<64x128xf32> to vector<8x128xf32>
    %c130 = arith.constant 130 : index
    %c0_18 = arith.constant 0 : index
    %27 = vector.load %arg12[%c130, %c0_18] : memref<192x128xf32, #tpu.memory_space<vmem>>, vector<8x128xf32>
    tpu.vector_store %arg12[%c130, %c0_18], %26 {strides = array<i32>} : memref<192x128xf32, #tpu.memory_space<vmem>>, vector<8x128xf32>,
    %28 = vector.extract_strided_slice %11 {offsets = [56, 0], sizes = [8, 128], strides = [1, 1]} : vector<64x128xf32> to vector<8x128xf32>
    %c146 = arith.constant 146 : index
    %c0_19 = arith.constant 0 : index
    %29 = vector.load %arg12[%c146, %c0_19] : memref<192x128xf32, #tpu.memory_space<vmem>>, vector<8x128xf32>
    tpu.vector_store %arg12[%c146, %c0_19], %28 {strides = array<i32>} : memref<192x128xf32, #tpu.memory_space<vmem>>, vector<8x128xf32>,
    %c35 = arith.constant 35 : index
    %c0_20 = arith.constant 0 : index
    %30 = vector.load %arg12[%c35, %c0_20] : memref<192x128xf32, #tpu.memory_space<vmem>>, vector<120x128xf32>
    %cst_21 = arith.constant 5.000000e-01 : f32
    %31 = vector.broadcast %cst_21 : f32 to vector<120x128xf32>
    %32 = arith.mulf %30, %31 : vector<120x128xf32>
    %c51 = arith.constant 51 : index
    %c0_22 = arith.constant 0 : index
    %33 = vector.load %arg12[%c51, %c0_22] : memref<192x128xf32, #tpu.memory_space<vmem>>, vector<120x128xf32>
    %cst_23 = arith.constant 5.000000e-01 : f32
    %34 = vector.broadcast %cst_23 : f32 to vector<120x128xf32>
    %35 = arith.mulf %33, %34 : vector<120x128xf32>
    %36 = arith.addf %32, %35 : vector<120x128xf32>
    %c50_24 = arith.constant 50 : index
    %c0_25 = arith.constant 0 : index
    %37 = vector.load %arg12[%c50_24, %c0_25] : memref<192x128xf32, #tpu.memory_space<vmem>>, vector<120x128xf32>
    %cst_26 = arith.constant 1.000000e+00 : f32
    %38 = vector.broadcast %cst_26 : f32 to vector<120x128xf32>
    %39 = arith.mulf %37, %38 : vector<120x128xf32>
    %c49 = arith.constant 49 : index
    %c0_27 = arith.constant 0 : index
    %40 = vector.load %arg12[%c49, %c0_27] : memref<192x128xf32, #tpu.memory_space<vmem>>, vector<120x128xf32>
    %cst_28 = arith.constant 1.000000e+00 : f32
    %41 = vector.broadcast %cst_28 : f32 to vector<120x128xf32>
    %42 = arith.mulf %40, %41 : vector<120x128xf32>
    %c17 = arith.constant 17 : index
    %c0_29 = arith.constant 0 : index
    %43 = vector.load %arg12[%c17, %c0_29] : memref<192x128xf32, #tpu.memory_space<vmem>>, vector<120x128xf32>
    %cst_30 = arith.constant 5.000000e-01 : f32
    %44 = vector.broadcast %cst_30 : f32 to vector<120x128xf32>
    %45 = arith.mulf %43, %44 : vector<120x128xf32>
    %c33 = arith.constant 33 : index
    %c0_31 = arith.constant 0 : index
    %46 = vector.load %arg12[%c33, %c0_31] : memref<192x128xf32, #tpu.memory_space<vmem>>, vector<120x128xf32>
    %cst_32 = arith.constant 5.000000e-01 : f32
    %47 = vector.broadcast %cst_32 : f32 to vector<120x128xf32>
    %48 = arith.mulf %46, %47 : vector<120x128xf32>
    %49 = arith.addf %45, %48 : vector<120x128xf32>
    %c18 = arith.constant 18 : index
    %c0_33 = arith.constant 0 : index
    %50 = vector.load %arg12[%c18, %c0_33] : memref<192x128xf32, #tpu.memory_space<vmem>>, vector<120x128xf32>
    %cst_34 = arith.constant 1.000000e+00 : f32
    %51 = vector.broadcast %cst_34 : f32 to vector<120x128xf32>
    %52 = arith.mulf %50, %51 : vector<120x128xf32>
    %c19 = arith.constant 19 : index
    %c0_35 = arith.constant 0 : index
    %53 = vector.load %arg12[%c19, %c0_35] : memref<192x128xf32, #tpu.memory_space<vmem>>, vector<120x128xf32>
    %cst_36 = arith.constant 1.000000e+00 : f32
    %54 = vector.broadcast %cst_36 : f32 to vector<120x128xf32>
    %55 = arith.mulf %53, %54 : vector<120x128xf32>
    %c36 = arith.constant 36 : index
    %c0_37 = arith.constant 0 : index
    %56 = vector.load %arg12[%c36, %c0_37] : memref<192x128xf32, #tpu.memory_space<vmem>>, vector<120x128xf32>
    %cst_38 = arith.constant 0.333333343 : f32
    %57 = vector.broadcast %cst_38 : f32 to vector<120x128xf32>
    %58 = arith.mulf %56, %57 : vector<120x128xf32>
    %c52 = arith.constant 52 : index
    %c0_39 = arith.constant 0 : index
    %59 = vector.load %arg12[%c52, %c0_39] : memref<192x128xf32, #tpu.memory_space<vmem>>, vector<120x128xf32>
    %cst_40 = arith.constant 0.333333343 : f32
    %60 = vector.broadcast %cst_40 : f32 to vector<120x128xf32>
    %61 = arith.mulf %59, %60 : vector<120x128xf32>
    %62 = arith.addf %58, %61 : vector<120x128xf32>
    %c68 = arith.constant 68 : index
    %c0_41 = arith.constant 0 : index
    %63 = vector.load %arg12[%c68, %c0_41] : memref<192x128xf32, #tpu.memory_space<vmem>>, vector<120x128xf32>
    %cst_42 = arith.constant 0.333333343 : f32
    %64 = vector.broadcast %cst_42 : f32 to vector<120x128xf32>
    %65 = arith.mulf %63, %64 : vector<120x128xf32>
    %66 = arith.addf %62, %65 : vector<120x128xf32>
    %c65 = arith.constant 65 : index
    %c0_43 = arith.constant 0 : index
    %67 = vector.load %arg12[%c65, %c0_43] : memref<192x128xf32, #tpu.memory_space<vmem>>, vector<120x128xf32>
    %cst_44 = arith.constant 0.333333343 : f32
    %68 = vector.broadcast %cst_44 : f32 to vector<120x128xf32>
    %69 = arith.mulf %67, %68 : vector<120x128xf32>
    %c66_45 = arith.constant 66 : index
    %c0_46 = arith.constant 0 : index
    %70 = vector.load %arg12[%c66_45, %c0_46] : memref<192x128xf32, #tpu.memory_space<vmem>>, vector<120x128xf32>
    %cst_47 = arith.constant 0.333333343 : f32
    %71 = vector.broadcast %cst_47 : f32 to vector<120x128xf32>
    %72 = arith.mulf %70, %71 : vector<120x128xf32>
    %73 = arith.addf %69, %72 : vector<120x128xf32>
    %c67 = arith.constant 67 : index
    %c0_48 = arith.constant 0 : index
    %74 = vector.load %arg12[%c67, %c0_48] : memref<192x128xf32, #tpu.memory_space<vmem>>, vector<120x128xf32>
    %cst_49 = arith.constant 0.333333343 : f32
    %75 = vector.broadcast %cst_49 : f32 to vector<120x128xf32>
    %76 = arith.mulf %74, %75 : vector<120x128xf32>
    %77 = arith.addf %73, %76 : vector<120x128xf32>
    %c48 = arith.constant 48 : index
    %c0_50 = arith.constant 0 : index
    %78 = vector.load %arg12[%c48, %c0_50] : memref<192x128xf32, #tpu.memory_space<vmem>>, vector<120x128xf32>
    %cst_51 = arith.constant 5.000000e-01 : f32
    %79 = vector.broadcast %cst_51 : f32 to vector<120x128xf32>
    %80 = arith.mulf %78, %79 : vector<120x128xf32>
    %c64 = arith.constant 64 : index
    %c0_52 = arith.constant 0 : index
    %81 = vector.load %arg12[%c64, %c0_52] : memref<192x128xf32, #tpu.memory_space<vmem>>, vector<120x128xf32>
    %cst_53 = arith.constant 5.000000e-01 : f32
    %82 = vector.broadcast %cst_53 : f32 to vector<120x128xf32>
    %83 = arith.mulf %81, %82 : vector<120x128xf32>
    %84 = arith.addf %80, %83 : vector<120x128xf32>
    %c0_54 = arith.constant 0 : index
    %c0_55 = arith.constant 0 : index
    %85 = vector.load %arg12[%c0_54, %c0_55] : memref<192x128xf32, #tpu.memory_space<vmem>>, vector<120x128xf32>
    %cst_56 = arith.constant 0.333333343 : f32
    %86 = vector.broadcast %cst_56 : f32 to vector<120x128xf32>
    %87 = arith.mulf %85, %86 : vector<120x128xf32>
    %c16 = arith.constant 16 : index
    %c0_57 = arith.constant 0 : index
    %88 = vector.load %arg12[%c16, %c0_57] : memref<192x128xf32, #tpu.memory_space<vmem>>, vector<120x128xf32>
    %cst_58 = arith.constant 0.333333343 : f32
    %89 = vector.broadcast %cst_58 : f32 to vector<120x128xf32>
    %90 = arith.mulf %88, %89 : vector<120x128xf32>
    %91 = arith.addf %87, %90 : vector<120x128xf32>
    %c32 = arith.constant 32 : index
    %c0_59 = arith.constant 0 : index
    %92 = vector.load %arg12[%c32, %c0_59] : memref<192x128xf32, #tpu.memory_space<vmem>>, vector<120x128xf32>
    %cst_60 = arith.constant 0.333333343 : f32
    %93 = vector.broadcast %cst_60 : f32 to vector<120x128xf32>
    %94 = arith.mulf %92, %93 : vector<120x128xf32>
    %95 = arith.addf %91, %94 : vector<120x128xf32>
    %c1 = arith.constant 1 : index
    %c0_61 = arith.constant 0 : index
    %96 = vector.load %arg12[%c1, %c0_61] : memref<192x128xf32, #tpu.memory_space<vmem>>, vector<120x128xf32>
    %cst_62 = arith.constant 0.333333343 : f32
    %97 = vector.broadcast %cst_62 : f32 to vector<120x128xf32>
    %98 = arith.mulf %96, %97 : vector<120x128xf32>
    %c2 = arith.constant 2 : index
    %c0_63 = arith.constant 0 : index
    %99 = vector.load %arg12[%c2, %c0_63] : memref<192x128xf32, #tpu.memory_space<vmem>>, vector<120x128xf32>
    %cst_64 = arith.constant 0.333333343 : f32
    %100 = vector.broadcast %cst_64 : f32 to vector<120x128xf32>
    %101 = arith.mulf %99, %100 : vector<120x128xf32>
    %102 = arith.addf %98, %101 : vector<120x128xf32>
    %c3 = arith.constant 3 : index
    %c0_65 = arith.constant 0 : index
    %103 = vector.load %arg12[%c3, %c0_65] : memref<192x128xf32, #tpu.memory_space<vmem>>, vector<120x128xf32>
    %cst_66 = arith.constant 0.333333343 : f32
    %104 = vector.broadcast %cst_66 : f32 to vector<120x128xf32>
    %105 = arith.mulf %103, %104 : vector<120x128xf32>
    %106 = arith.addf %102, %105 : vector<120x128xf32>
    %c4 = arith.constant 4 : index
    %c0_67 = arith.constant 0 : index
    %107 = vector.load %arg12[%c4, %c0_67] : memref<192x128xf32, #tpu.memory_space<vmem>>, vector<120x128xf32>
    %cst_68 = arith.constant 5.000000e-01 : f32
    %108 = vector.broadcast %cst_68 : f32 to vector<120x128xf32>
    %109 = arith.mulf %107, %108 : vector<120x128xf32>
    %c20 = arith.constant 20 : index
    %c0_69 = arith.constant 0 : index
    %110 = vector.load %arg12[%c20, %c0_69] : memref<192x128xf32, #tpu.memory_space<vmem>>, vector<120x128xf32>
    %cst_70 = arith.constant 5.000000e-01 : f32
    %111 = vector.broadcast %cst_70 : f32 to vector<120x128xf32>
    %112 = arith.mulf %110, %111 : vector<120x128xf32>
    %113 = arith.addf %109, %112 : vector<120x128xf32>
    %c34_71 = arith.constant 34 : index
    %c0_72 = arith.constant 0 : index
    %114 = vector.load %arg12[%c34_71, %c0_72] : memref<192x128xf32, #tpu.memory_space<vmem>>, vector<120x128xf32>
    %115 = tpu.concatenate %36, %39, %42, %49, %52, %55, %66, %77, %84, %95, %106, %113, %114 in 1 : vector<120x128xf32>, vector<120x128xf32>, vector<120x128xf32>, vector<120x128xf32>, vector<120x128xf32>, vector<120x128xf32>, vector<120x128xf32>, vector<120x128xf32>, vector<120x128xf32>, vector<120x128xf32>, vector<120x128xf32>, vector<120x128xf32>, vector<120x128xf32> -> vector<120x1664xf32>
    %116 = vector.extract_strided_slice %115 {offsets = [0, 0], sizes = [8, 1664], strides = [1, 1]} : vector<120x1664xf32> to vector<8x1664xf32>
    %117 = vector.extract_strided_slice %115 {offsets = [16, 0], sizes = [8, 1664], strides = [1, 1]} : vector<120x1664xf32> to vector<8x1664xf32>
    %118 = vector.extract_strided_slice %115 {offsets = [32, 0], sizes = [8, 1664], strides = [1, 1]} : vector<120x1664xf32> to vector<8x1664xf32>
    %119 = vector.extract_strided_slice %115 {offsets = [48, 0], sizes = [8, 1664], strides = [1, 1]} : vector<120x1664xf32> to vector<8x1664xf32>
    %120 = vector.extract_strided_slice %115 {offsets = [64, 0], sizes = [8, 1664], strides = [1, 1]} : vector<120x1664xf32> to vector<8x1664xf32>
    %121 = vector.extract_strided_slice %115 {offsets = [80, 0], sizes = [8, 1664], strides = [1, 1]} : vector<120x1664xf32> to vector<8x1664xf32>
    %122 = vector.extract_strided_slice %115 {offsets = [96, 0], sizes = [8, 1664], strides = [1, 1]} : vector<120x1664xf32> to vector<8x1664xf32>
    %123 = vector.extract_strided_slice %115 {offsets = [112, 0], sizes = [8, 1664], strides = [1, 1]} : vector<120x1664xf32> to vector<8x1664xf32>
    %124 = tpu.concatenate %116, %117, %118, %119, %120, %121, %122, %123 in 0 : vector<8x1664xf32>, vector<8x1664xf32>, vector<8x1664xf32>, vector<8x1664xf32>, vector<8x1664xf32>, vector<8x1664xf32>, vector<8x1664xf32>, vector<8x1664xf32> -> vector<64x1664xf32>
    %125 = arith.truncf %124 : vector<64x1664xf32> to vector<64x1664xbf16>
    %c0_73 = arith.constant 0 : index
    %c0_74 = arith.constant 0 : index
    %126 = vector.load %arg3[%c0_73, %c0_74] : memref<1664x128xbf16, #tpu.memory_space<vmem>>, vector<1664x128xbf16>
    %cst_75 = arith.constant dense<0.000000e+00> : vector<64x128xf32>
    %127 = tpu.matmul %125, %126, %cst_75 {dimension_numbers = #tpu.dot_dimension_numbers<[1], [0], [0], [1], [0, 0, 1, 1], [], []>} : vector<64x1664xbf16>, vector<1664x128xbf16>, vector<64x128xf32> -> vector<64x128xf32>
    %c0_76 = arith.constant 0 : index
    %c0_77 = arith.constant 0 : index
    %128 = vector.load %arg7[%c0_76, %c0_77] : memref<1x128xf32, #tpu.memory_space<vmem>>, vector<1x128xf32>
    %129 = vector.broadcast %128 : vector<1x128xf32> to vector<64x128xf32>
    %130 = arith.mulf %127, %129 : vector<64x128xf32>
    %c0_78 = arith.constant 0 : index
    %c0_79 = arith.constant 0 : index
    %131 = vector.load %arg8[%c0_78, %c0_79] : memref<1x128xf32, #tpu.memory_space<vmem>>, vector<1x128xf32>
    %132 = vector.broadcast %131 : vector<1x128xf32> to vector<64x128xf32>
    %133 = arith.addf %130, %132 : vector<64x128xf32>
    %cst_80 = arith.constant 0.000000e+00 : f32
    %134 = vector.broadcast %cst_80 : f32 to vector<64x128xf32>
    %135 = arith.maximumf %133, %134 : vector<64x128xf32>
    %136 = arith.truncf %135 : vector<64x128xf32> to vector<64x128xbf16>
    %c0_81 = arith.constant 0 : index
    %c0_82 = arith.constant 0 : index
    %137 = vector.load %arg4[%c0_81, %c0_82] : memref<128x128xbf16, #tpu.memory_space<vmem>>, vector<128x128xbf16>
    %cst_83 = arith.constant dense<0.000000e+00> : vector<64x128xf32>
    %138 = tpu.matmul %136, %137, %cst_83 {dimension_numbers = #tpu.dot_dimension_numbers<[1], [0], [0], [1], [0, 0, 1, 1], [], []>} : vector<64x128xbf16>, vector<128x128xbf16>, vector<64x128xf32> -> vector<64x128xf32>
    %139 = arith.extf %1 : vector<64x128xbf16> to vector<64x128xf32>
    %c0_84 = arith.constant 0 : index
    %c0_85 = arith.constant 0 : index
    %140 = vector.load %arg9[%c0_84, %c0_85] : memref<1x128xf32, #tpu.memory_space<vmem>>, vector<1x128xf32>
    %141 = vector.broadcast %140 : vector<1x128xf32> to vector<64x128xf32>
    %142 = arith.mulf %138, %141 : vector<64x128xf32>
    %c0_86 = arith.constant 0 : index
    %c0_87 = arith.constant 0 : index
    %143 = vector.load %arg10[%c0_86, %c0_87] : memref<1x128xf32, #tpu.memory_space<vmem>>, vector<1x128xf32>
    %144 = vector.broadcast %143 : vector<1x128xf32> to vector<64x128xf32>
    %145 = arith.addf %142, %144 : vector<64x128xf32>
    %146 = arith.addf %145, %139 : vector<64x128xf32>
    %cst_88 = arith.constant 0.000000e+00 : f32
    %147 = vector.broadcast %cst_88 : f32 to vector<64x128xf32>
    %148 = arith.maximumf %146, %147 : vector<64x128xf32>
    %c0_89 = arith.constant 0 : index
    %c0_90 = arith.constant 0 : index
    %c0_91 = arith.constant 0 : index
    %149 = vector.load %arg11[%c0_89, %c0_90, %c0_91] : memref<1x64x128xf32, #tpu.memory_space<vmem>>, vector<1x64x128xf32>
    %150 = vector.shape_cast %149 : vector<1x64x128xf32> to vector<64x128xf32>
    %151 = vector.shape_cast %148 : vector<64x128xf32> to vector<1x64x128xf32>
    tpu.vector_store %arg11[%c0_89, %c0_90, %c0_91], %151 {strides = array<i32>} : memref<1x64x128xf32, #tpu.memory_space<vmem>>, vector<1x64x128xf32>,
    return
  }
  func.func @transform_0(%arg0: i32) -> (i32, i32, i32) {
    %c0_i32 = arith.constant 0 : i32
    %c0_i32_0 = arith.constant 0 : i32
    %c0_i32_1 = arith.constant 0 : i32
    return %arg0, %c0_i32, %c0_i32_0 : i32, i32, i32
  }
  func.func @transform_1(%arg0: i32) -> (i32, i32) {
    %c0_i32 = arith.constant 0 : i32
    %c0_i32_0 = arith.constant 0 : i32
    %c0_i32_1 = arith.constant 0 : i32
    return %c0_i32, %c0_i32_0 : i32, i32
  }
  func.func @transform_2(%arg0: i32) -> (i32, i32) {
    %c0_i32 = arith.constant 0 : i32
    %c0_i32_0 = arith.constant 0 : i32
    %c0_i32_1 = arith.constant 0 : i32
    return %c0_i32, %c0_i32_0 : i32, i32
  }
  func.func @transform_3(%arg0: i32) -> (i32, i32) {
    %c0_i32 = arith.constant 0 : i32
    %c0_i32_0 = arith.constant 0 : i32
    %c0_i32_1 = arith.constant 0 : i32
    return %c0_i32, %c0_i32_0 : i32, i32
  }
  func.func @transform_4(%arg0: i32) -> (i32, i32) {
    %c0_i32 = arith.constant 0 : i32
    %c0_i32_0 = arith.constant 0 : i32
    %c0_i32_1 = arith.constant 0 : i32
    return %c0_i32, %c0_i32_0 : i32, i32
  }
  func.func @transform_5(%arg0: i32) -> (i32, i32) {
    %c0_i32 = arith.constant 0 : i32
    %c0_i32_0 = arith.constant 0 : i32
    %c0_i32_1 = arith.constant 0 : i32
    return %c0_i32, %c0_i32_0 : i32, i32
  }
  func.func @transform_6(%arg0: i32) -> (i32, i32) {
    %c0_i32 = arith.constant 0 : i32
    %c0_i32_0 = arith.constant 0 : i32
    %c0_i32_1 = arith.constant 0 : i32
    return %c0_i32, %c0_i32_0 : i32, i32
  }
  func.func @transform_7(%arg0: i32) -> (i32, i32) {
    %c0_i32 = arith.constant 0 : i32
    %c0_i32_0 = arith.constant 0 : i32
    %c0_i32_1 = arith.constant 0 : i32
    return %c0_i32, %c0_i32_0 : i32, i32
  }
  func.func @transform_8(%arg0: i32) -> (i32, i32) {
    %c0_i32 = arith.constant 0 : i32
    %c0_i32_0 = arith.constant 0 : i32
    %c0_i32_1 = arith.constant 0 : i32
    return %c0_i32, %c0_i32_0 : i32, i32
  }
  func.func @transform_9(%arg0: i32) -> (i32, i32) {
    %c0_i32 = arith.constant 0 : i32
    %c0_i32_0 = arith.constant 0 : i32
    %c0_i32_1 = arith.constant 0 : i32
    return %c0_i32, %c0_i32_0 : i32, i32
  }
  func.func @transform_10(%arg0: i32) -> (i32, i32, i32) {
    %c0_i32 = arith.constant 0 : i32
    %c0_i32_0 = arith.constant 0 : i32
    %c0_i32_1 = arith.constant 0 : i32
    return %arg0, %c0_i32, %c0_i32_0 : i32, i32, i32
  }
}

</mosaic_0001>

<bundles_post_ra>
// kernel: _lambda_.1
= control target key start
LH: loop header
LB: loop body
LE: loop exit
PB: predicated region body
PF: predicated region fallthrough
CT: control target
= control target key end

     0   :  { %15 = vsyncpa [#allocation4], 0  ;;  %s3242_s13 = smov 0   ;;  %s3690_s0 = inlined_call_operand.vmem [shape: bf16[2,64,128], index: 0, kind: input, shape index: {}]   ;;  %s3691_s1 = inlined_call_operand.vmem [shape: bf16[128,128], index: 1, kind: input, shape index: {}]   ;;  %s3692_s2 = inlined_call_operand.hbm [shape: bf16[1664,128], index: 2, kind: input, shape index: {}]   ;;  %s3693_s3 = inlined_call_operand.vmem [shape: bf16[128,128], index: 3, kind: input, shape index: {}]   ;;  %s3694_s4 = inlined_call_operand.vmem [shape: f32[1,128], index: 4, kind: input, shape index: {}]   ;;  %s3695_s5 = inlined_call_operand.vmem [shape: f32[1,128], index: 5, kind: input, shape index: {}]   ;;  %s3696_s6 = inlined_call_operand.vmem [shape: f32[1,128], index: 6, kind: input, shape index: {}]   ;;  %s3697_s7 = inlined_call_operand.vmem [shape: f32[1,128], index: 7, kind: input, shape index: {}]   ;;  %s3698_s8 = inlined_call_operand.vmem [shape: f32[1,128], index: 8, kind: input, shape index: {}]   ;;  %s3699_s9 = inlined_call_operand.vmem [shape: f32[1,128], index: 9, kind: input, shape index: {}]   ;;  %s3700_s10 = inlined_call_operand.vmem [shape: f32[2,64,128], index: 10, kind: output, shape index: {}]  }
   0x1 LB: > { %s2481_s14 = sadd.s32 4294967295, %s3181_s13   ;;  %p2483_p0 = scmp.ge.s32.totalorder %s3181_s13, 1  ;;  %s3181_s13 = sphi %s3242_s13, %s21_s13  }
   0x2   : > { %p267_p1 = scmp.lt.s32.totalorder %s3181_s13, 3  ;;  %s3183_s15 = smov [#allocation3]  }
   0x3   : > { %s282_s16 = sshll.u32 %s3183_s15, 4  ;;  %p2998_p3 = scmp.eq.s32.totalorder %s2481_s14, 0  ;;  %s283_s16 = int_to_ptr.vmem [resolvable:$true] %s282_s16 }
   0x4   : > { %p3250_p2 = pnand %p2483_p0, %p267_p1  ;;  %s3156_s18 = scalar_lea.vmem %s283_s16, 13312 }
   0x5   : > { %p3157_p7 = scmp.ne.s32.totalorder %s283_s16, %s3156_s18  ;;  %p3164_p10 = scmp.lt.s32.totalorder %s283_s16, %s283_s16 }
   0x6   : > { %p2994_p4 = pneg %p3250_p2  ;;  %p3165_p11 = scmp.lt.s32.totalorder %s3156_s18, %s3156_s18 }
   0x8   : > { %p2995_p5 = pnand %p2998_p3, %p2994_p4  ;;  %p3166_p12 = por %p3165_p11, %p3164_p10 }
   0xa   : > { %p3147_p6 = pneg %p2995_p5 }
   0xc   : > { %p3159_p8 = pnand %p3157_p7, %p3147_p6 }
   0xe   : > { %p3160_p9 = pneg %p3159_p8 }
  0x10   : > { %p3167_p13 = pnand %p3166_p12, %p3160_p9 }
  0x12   : > { %3170 = shalt.err (!%p3167_p13)
}
  0x13   : > { %s3184_s19 = smov 64   ;;  %s3185_s20 = smov 4  }
  0x14   : > { %2997 = dma.hbm_to_vmem [thread:$0]  (!%p2995_p5), %s3692_s2, 13312, %s283_s16, [#allocation4], %s3184_s19, %s3184_s19, %s3185_s20  }
  0x15   : > { %327 = sbr.rel (%p3250_p2) target bundleno = 801 (0x321), region = 60 }
  0x1a   : > { %3176 = dma.done.wait (%p2998_p3), [#allocation4], 13312  }
  0x1b   : > { %3178 = vsyncadd (%p2998_p3), [#allocation4], 4294953984  ;;  %p365_p0 = scmp.lt.s32.totalorder %s2481_s14, 1  ;;  %v3012_v0 = vld [vmem:[%s3691_s1 + $0x38] sm:$0xff]   ;;  %v3013_v1 = vld [vmem:[%s3691_s1 + $0x30] sm:$0xff]   ;;  %v3186_v20 = vmov 0.0  }
  0x1c   : > { %2902 = vmatprep.subr.bf16.mxu0 %v3012_v0  ;;  %v3014_v2 = vld [vmem:[%s3691_s1 + $0x28] sm:$0xff]   ;;  %v3015_v3 = vld [vmem:[%s3691_s1 + $0x20] sm:$0xff]   ;;  %v3024_v5 = vld [vmem:[#allocation3 + $0x78] sm:$0xff]   ;;  %583 = vst [vmem:[#allocation2 + $0x40] sm:$0xff] %v3186_v20 }
  0x1d   : > { %s3727_s14 = smov (!%p365_p0, %s2481_s14), 1  ;;  %2903 = vmatpush3.bf16.msra.mxu0 %v3012_v0  ;;  %v3025_v6 = vld [vmem:[#allocation3 + $0x38] sm:$0xff]   ;;  %2638 = vmatprep.subr.bf16.mxu1 %v3024_v5  ;;  %v3017_v8 = vld [vmem:[%s3691_s1 + $0x10] sm:$0xff]   ;;  %v3018_v11 = vld [vmem:[%s3691_s1 + $0x8] sm:$0xff]   ;;  %584 = vst [vmem:[#allocation2 + $0x48] sm:$0xff] %v3186_v20 }
  0x1e   : > { %s2624_s27 = sshll.u32 %s3727_s14, 5  ;;  %2904 = vmatprep.subr.bf16.mxu0 %v3013_v1  ;;  %v3016_v7 = vld [vmem:[%s3691_s1 + $0x18] sm:$0xff]   ;;  %2639 = vmatpush3.bf16.msra.mxu1 %v3025_v6  ;;  %v3028_v9 = vld [vmem:[#allocation3 + $0x70] sm:$0xff]   ;;  %v3019_v12 = vld [vmem:[%s3691_s1] sm:$0xff]   ;;  %575 = vst [vmem:[#allocation2] sm:$0xff] %v3186_v20  ;;  %s2625_s19 = sshll.u32 %s3727_s14, 6 }
  0x1f   : > { %s3279_s12 = scalar_lea.vmem %s3690_s0, %s2624_s27  ;;  %v3029_v10 = vld [vmem:[#allocation3 + $0x30] sm:$0xff]   ;;  %2640 = vmatprep.subr.bf16.mxu1 %v3028_v9  ;;  %v3026_v15 = vld [vmem:[#allocation3 + $0xf8] sm:$0xff]   ;;  %576 = vst [vmem:[#allocation2 + $0x8] sm:$0xff] %v3186_v20  ;;  %577 = vst [vmem:[#allocation2 + $0x10] sm:$0xff] %v3186_v20  ;;  %s3675_s22 = scalar_lea.vmem %s3700_s10, %s2625_s19 }
  0x20   : > { %v376_v4 = vld [vmem:[%s3279_s12] sm:$0xff]   ;;  %v378_v13 = vld [vmem:[%s3279_s12 + $0x8] sm:$0xff]   ;;  %v380_v14 = vld [vmem:[%s3279_s12 + $0x10] sm:$0xff]   ;;  %578 = vst [vmem:[#allocation2 + $0x18] sm:$0xff] %v3186_v20 }
  0x21   : > { %2905 = vmatpush3.bf16.msra.mxu0 %v3013_v1  ;;  %2918 = vmatprep.mubr.bf16.mxu0 %v376_v4  ;;  %v3027_v16 = vld [vmem:[#allocation3 + $0xb8] sm:$0xff]   ;;  %v3030_v18 = vld [vmem:[#allocation3 + $0xf0] sm:$0xff]   ;;  %579 = vst [vmem:[#allocation2 + $0x20] sm:$0xff] %v3186_v20  ;;  %580 = vst [vmem:[#allocation2 + $0x28] sm:$0xff] %v3186_v20 }
  0x22   : > { %2906 = vmatprep.subr.bf16.mxu0 %v3014_v2  ;;  %2641 = vmatpush3.bf16.msra.mxu1 %v3029_v10  ;;  %v382_v17 = vld [vmem:[%s3279_s12 + $0x18] sm:$0xff]   ;;  %v3031_v19 = vld [vmem:[#allocation3 + $0xb0] sm:$0xff]   ;;  %581 = vst [vmem:[#allocation2 + $0x30] sm:$0xff] %v3186_v20  ;;  %582 = vst [vmem:[#allocation2 + $0x38] sm:$0xff] %v3186_v20 }
  0x23   : > { %585 = vst [vmem:[#allocation2 + $0x50] sm:$0xff] %v3186_v20  ;;  %586 = vst [vmem:[#allocation2 + $0x58] sm:$0xff] %v3186_v20  ;;  %v3032_v21 = vld [vmem:[#allocation3 + $0x68] sm:$0xff]   ;;  %v3036_v25 = vld [vmem:[#allocation3 + $0x60] sm:$0xff]  }
  0x24   : > { %587 = vst [vmem:[#allocation2 + $0x60] sm:$0xff] %v3186_v20  ;;  %588 = vst [vmem:[#allocation2 + $0x68] sm:$0xff] %v3186_v20  ;;  %v3033_v22 = vld [vmem:[#allocation3 + $0x28] sm:$0xff]   ;;  %2642 = vmatprep.subr.bf16.mxu1 %v3032_v21  ;;  %v3037_v26 = vld [vmem:[#allocation3 + $0x20] sm:$0xff]  }
  0x25   : > { %2907 = vmatpush3.bf16.msra.mxu0 %v3014_v2  ;;  %589 = vst [vmem:[#allocation2 + $0x70] sm:$0xff] %v3186_v20  ;;  %590 = vst [vmem:[#allocation2 + $0x78] sm:$0xff] %v3186_v20  ;;  %v3034_v23 = vld [vmem:[#allocation3 + $0xe8] sm:$0xff]   ;;  %v3038_v27 = vld [vmem:[#allocation3 + $0xe0] sm:$0xff]  }
  0x26   : > { %2908 = vmatprep.subr.bf16.mxu0 %v3015_v3  ;;  %591 = vst [vmem:[#allocation2 + $0x80] sm:$0xff] %v3186_v20  ;;  %592 = vst [vmem:[#allocation2 + $0x88] sm:$0xff] %v3186_v20  ;;  %v3035_v24 = vld [vmem:[#allocation3 + $0xa8] sm:$0xff]   ;;  %2643 = vmatpush3.bf16.msra.mxu1 %v3033_v22  ;;  %v3039_v28 = vld [vmem:[#allocation3 + $0xa0] sm:$0xff]  }
  0x27   : > { %593 = vst [vmem:[#allocation2 + $0x90] sm:$0xff] %v3186_v20  ;;  %594 = vst [vmem:[#allocation2 + $0x98] sm:$0xff] %v3186_v20  ;;  %2644 = vmatprep.subr.bf16.mxu1 %v3036_v25  ;;  %v3040_v29 = vld [vmem:[#allocation3 + $0x58] sm:$0xff]   ;;  %v3044_v33 = vld [vmem:[#allocation3 + $0x50] sm:$0xff]  }
  0x28   : > { %595 = vst [vmem:[#allocation2 + $0xa0] sm:$0xff] %v3186_v20  ;;  %596 = vst [vmem:[#allocation2 + $0xa8] sm:$0xff] %v3186_v20  ;;  %v3041_v30 = vld [vmem:[#allocation3 + $0x18] sm:$0xff]   ;;  %v3045_v34 = vld [vmem:[#allocation3 + $0x10] sm:$0xff]  }
  0x29   : > { %2909 = vmatpush3.bf16.msra.mxu0 %v3015_v3  ;;  %597 = vst [vmem:[#allocation2 + $0xb0] sm:$0xff] %v3186_v20  ;;  %598 = vst [vmem:[#allocation2 + $0xb8] sm:$0xff] %v3186_v20  ;;  %v3042_v31 = vld [vmem:[#allocation3 + $0xd8] sm:$0xff]   ;;  %v3046_v35 = vld [vmem:[#allocation3 + $0xd0] sm:$0xff]  }
  0x2a   : > { %2910 = vmatprep.subr.bf16.mxu0 %v3016_v7  ;;  %2645 = vmatpush3.bf16.msra.mxu1 %v3037_v26  ;;  %v3043_v32 = vld [vmem:[#allocation3 + $0x98] sm:$0xff]   ;;  %v3047_v36 = vld [vmem:[#allocation3 + $0x90] sm:$0xff]   ;;  %v3048_v37 = vld [vmem:[#allocation3 + $0x48] sm:$0xff]  }
  0x2b   : > { %2646 = vmatprep.subr.bf16.mxu1 %v3040_v29  ;;  %v3049_v38 = vld [vmem:[#allocation3 + $0x8] sm:$0xff]   ;;  %v3052_v41 = vld [vmem:[#allocation3 + $0x40] sm:$0xff]   ;;  %v3056_v45 = vld [vmem:[#allocation3 + $0x178] sm:$0xff]  }
  0x2c   : > { %v3050_v39 = vld [vmem:[#allocation3 + $0xc8] sm:$0xff]   ;;  %v3053_v42 = vld [vmem:[#allocation3] sm:$0xff]   ;;  %v3058_v46 = vld [vmem:[#allocation3 + $0x1f8] sm:$0xff]  }
  0x2d   : > { %2911 = vmatpush3.bf16.msra.mxu0 %v3016_v7  ;;  %v3051_v40 = vld [vmem:[#allocation3 + $0x88] sm:$0xff]   ;;  %v3054_v43 = vld [vmem:[#allocation3 + $0xc0] sm:$0xff]  }
  0x2e   : > { %2912 = vmatprep.subr.bf16.mxu0 %v3017_v8  ;;  %2647 = vmatpush3.bf16.msra.mxu1 %v3041_v30  ;;  %v3055_v44 = vld [vmem:[#allocation3 + $0x80] sm:$0xff]  }
  0x2f   : > { %2648 = vmatprep.subr.bf16.mxu1 %v3044_v33  ;;  %v2504_v47 = vld [vmem:[%s3694_s4] ss:$0 sm:$0xff] }
  0x30   : > { %v2505_v49 = vld [vmem:[%s3695_s5] ss:$0 sm:$0xff] }
  0x31   : > { %2913 = vmatpush3.bf16.msra.mxu0 %v3017_v8 }
  0x32   : > { %2914 = vmatprep.subr.bf16.mxu0 %v3018_v11  ;;  %2649 = vmatpush3.bf16.msra.mxu1 %v3045_v34 }
  0x33   : > { %2650 = vmatprep.subr.bf16.mxu1 %v3048_v37 }
  0x35   : > { %2915 = vmatpush3.bf16.msra.mxu0 %v3018_v11 }
  0x36   : > { %2916 = vmatprep.subr.bf16.mxu0 %v3019_v12  ;;  %2651 = vmatpush3.bf16.msra.mxu1 %v3049_v38 }
  0x37   : > { %2652 = vmatprep.subr.bf16.mxu1 %v3052_v41 }
  0x39   : > { %2917 = vmatpush3.bf16.msra.mxu0 %v3019_v12 }
  0x3a   : > { %2678 = vmatprep.subr.bf16.mxu0 %v3026_v15  ;;  %2653 = vmatpush3.bf16.msra.mxu1 %v3053_v42 }
  0x3b   : > { %2718 = vmatprep.subr.bf16.mxu1 %v3056_v45 }
  0x3c   : > { %2919 = vmatmul.mubr.bf16.vlgmr.msra.gmra.mxu0 %v378_v13 }
  0x3d   : > { %2922 = vmatprep.mubr.bf16.mxu0 %v380_v14  ;;  %2679 = vmatpush3.bf16.msra.mxu0 %v3027_v16 }
  0x3e   : > { %2680 = vmatprep.subr.bf16.mxu0 %v3030_v18 }
  0x41   : > { %2681 = vmatpush3.bf16.msra.mxu0 %v3031_v19 }
  0x42   : > { %2682 = vmatprep.subr.bf16.mxu0 %v3034_v23 }
  0x44   : > { %2923 = vmatmul.mubr.bf16.gmra.mxu0 %v382_v17  ;;  %v3332_v17 = vld [vmem:[#allocation2 + $0x11] sm:$0xff] }
  0x45   : > { %2683 = vmatpush3.bf16.msra.mxu0 %v3035_v24  ;;  %v651_v24 = vmul.f32 0.5, %v3332_v17 }
  0x46   : > { %2684 = vmatprep.subr.bf16.mxu0 %v3038_v27 }
  0x49   : > { %2685 = vmatpush3.bf16.msra.mxu0 %v3039_v28 }
  0x4a   : > { %2686 = vmatprep.subr.bf16.mxu0 %v3042_v31 }
  0x4d   : > { %2687 = vmatpush3.bf16.msra.mxu0 %v3043_v32 }
  0x4e   : > { %2688 = vmatprep.subr.bf16.mxu0 %v3046_v35 }
  0x51   : > { %2689 = vmatpush3.bf16.msra.mxu0 %v3047_v36 }
  0x52   : > { %2690 = vmatprep.subr.bf16.mxu0 %v3050_v39 }
  0x55   : > { %2691 = vmatpush3.bf16.msra.mxu0 %v3051_v40  ;;  %v3057_v40 = vld [vmem:[#allocation3 + $0x138] sm:$0xff]  }
  0x56   : > { %2692 = vmatprep.subr.bf16.mxu0 %v3054_v43 }
  0x59   : > { %2693 = vmatpush3.bf16.msra.mxu0 %v3055_v44 }
  0x5a   : > { %2758 = vmatprep.subr.bf16.mxu0 %v3058_v46  ;;  %v3060_v46 = vld [vmem:[#allocation3 + $0x170] sm:$0xff]  }
  0xfc   : > { %v2920_v48 = vpop.f32.mrf.mxu0 }
  0xfd   : > { %v546_v50 = vmul.f32 %v2920_v48, %v2504_v47 }
  0xfe   : > { %v506_v51 = vpop.f32.mrf.mxu0 }
  0xff   : > { %v561_v52 = vadd.f32 %v2505_v49, %v546_v50  ;;  %v544_v53 = vmul.f32 %v2504_v47, %v506_v51  ;;  %v3059_v50 = vld [vmem:[#allocation3 + $0x1b8] sm:$0xff]  }
 0x100   : > { %v2921_v54 = vpop.f32.mrf.mxu0 }
 0x101   : > { %v3306_v55 = vmax.f32 %v561_v52, 0.0  ;;  %v559_v56 = vadd.f32 %v2505_v49, %v544_v53  ;;  %v547_v57 = vmul.f32 %v2921_v54, %v2504_v47  ;;  %v3062_v52 = vld [vmem:[#allocation3 + $0x1f0] sm:$0xff]  }
 0x102   : > { %v509_v58 = vpop.f32.mrf.mxu0 }
 0x103   : > { %601 = vst [vmem:[#allocation2 + $0x42] sm:$0xff] %v3306_v55  ;;  %v3309_v59 = vmax.f32 %v559_v56, 0.0  ;;  %v562_v60 = vadd.f32 %v2505_v49, %v547_v57  ;;  %v545_v61 = vmul.f32 %v2504_v47, %v509_v58  ;;  %v3061_v57 = vld [vmem:[#allocation3 + $0x130] sm:$0xff]  }
 0x104   : > { %v2924_v62 = vpop.f32.mrf.mxu0 }
 0x105   : > { %599 = vst [vmem:[#allocation2 + $0x22] sm:$0xff] %v3309_v59  ;;  %v3312_v63 = vmax.f32 %v562_v60, 0.0  ;;  %v560_v0 = vadd.f32 %v2505_v49, %v545_v61  ;;  %v550_v1 = vmul.f32 %v2924_v62, %v2504_v47  ;;  %v3064_v60 = vld [vmem:[#allocation3 + $0x168] sm:$0xff]  }
 0x106   : > { %v522_v2 = vpop.f32.mrf.mxu0 }
 0x107   : > { %602 = vst [vmem:[#allocation2 + $0x52] sm:$0xff] %v3312_v63  ;;  %v3315_v3 = vmax.f32 %v560_v0, 0.0  ;;  %v565_v4 = vadd.f32 %v2505_v49, %v550_v1  ;;  %v548_v5 = vmul.f32 %v2504_v47, %v522_v2  ;;  %v871_v6 = vpack.c.bf16 %v3312_v63, %v3306_v55  ;;  %v3063_v0 = vld [vmem:[#allocation3 + $0x1b0] sm:$0xff]  }
 0x108   : > { %v2925_v7 = vpop.f32.mrf.mxu0 }
 0x109   : > { %600 = vst [vmem:[#allocation2 + $0x32] sm:$0xff] %v3315_v3  ;;  %v3320_v8 = vmax.f32 %v565_v4, 0.0  ;;  %v563_v9 = vadd.f32 %v2505_v49, %v548_v5  ;;  %v551_v10 = vmul.f32 %v2925_v7, %v2504_v47  ;;  %v3324_v12 = vpack.c.bf16 %v3306_v55, %v3315_v3  ;;  %v3066_v5 = vld [vmem:[#allocation3 + $0x1e8] sm:$0xff]  }
 0x10a   : > { %v525_v11 = vpop.f32.mrf.mxu0  ;;  %v859_v13 = vpack.c.bf16 %v3315_v3, %v3309_v59  ;;  %v3341_v22 = vld [vmem:[#allocation2 + $0x43] sm:$0xff] }
 0x10b   : > { %605 = vst [vmem:[#allocation2 + $0x82] sm:$0xff] %v3320_v8  ;;  %v3329_v14 = vmax.f32 %v563_v9, 0.0  ;;  %v566_v15 = vadd.f32 %v2505_v49, %v551_v10  ;;  %v549_v16 = vmul.f32 %v2504_v47, %v525_v11  ;;  %1758 = vmatprep.mubr.bf16.mxu1 %v3324_v12  ;;  %v3348_v26 = vld [vmem:[#allocation2 + $0x41] sm:$0xff]  ;;  %v617_v32 = vmul.f32 0.5, %v3341_v22 }
 0x10c   : > { %v3334_v18 = vld [vmem:[#allocation2 + $0x21] sm:$0xff]  ;;  %v654_v34 = vmul.f32 0.5, %v3348_v26 }
 0x10d   : > { %603 = vst [vmem:[#allocation2 + $0x62] sm:$0xff] %v3329_v14  ;;  %v3337_v19 = vmax.f32 %v566_v15, 0.0  ;;  %v564_v20 = vadd.f32 %v2505_v49, %v549_v16  ;;  %v3339_v21 = vld [vmem:[#allocation2 + $0x23] sm:$0xff]  ;;  %v652_v25 = vmul.f32 0.5, %v3334_v18  ;;  %v3370_v48 = vpack.c.bf16 %v3329_v14, %v3312_v63 }
 0x10e   : > { %v3350_v27 = vld [vmem:[#allocation2 + $0x51] sm:$0xff]  ;;  %v615_v30 = vmul.f32 0.5, %v3339_v21  ;;  %v3065_v7 = vld [vmem:[#allocation3 + $0x128] sm:$0xff]   ;;  %v3068_v11 = vld [vmem:[#allocation3 + $0x160] sm:$0xff]  }
 0x10f   : > { %606 = vst [vmem:[#allocation2 + $0x92] sm:$0xff] %v3337_v19  ;;  %v3344_v23 = vmax.f32 %v564_v20, 0.0  ;;  %v655_v35 = vmul.f32 0.5, %v3350_v27  ;;  %v660_v38 = vadd.f32 %v652_v25, %v651_v24  ;;  %v3363_v42 = vld [vmem:[#allocation2 + $0x53] sm:$0xff]  ;;  %v3067_v24 = vld [vmem:[#allocation3 + $0x1a8] sm:$0xff]  }
 0x110   : > { %v3352_v28 = vld [vmem:[#allocation2 + $0x33] sm:$0xff]  ;;  %v618_v53 = vmul.f32 0.5, %v3363_v42 }
 0x111   : > { %v3354_v29 = vld [vmem:[#allocation2 + $0x31] sm:$0xff]  ;;  %604 = vst [vmem:[#allocation2 + $0x72] sm:$0xff] %v3344_v23  ;;  %v616_v31 = vmul.f32 0.5, %v3352_v28  ;;  %v663_v49 = vadd.f32 %v655_v35, %v654_v34  ;;  %v3387_v16 = vpack.c.bf16 %v3320_v8, %v3344_v23 }
 0x112   : > { %v653_v33 = vmul.f32 0.5, %v3354_v29  ;;  %v849_v51 = vpack.c.bf16 %v3348_v26, %v3354_v29  ;;  %v627_v4 = vadd.f32 %v618_v53, %v617_v32 }
 0x113   : > { %v625_v36 = vadd.f32 %v616_v31, %v615_v30  ;;  %v626_v37 = vadd.f32 %v617_v32, %v616_v31  ;;  %v3070_v31 = vld [vmem:[#allocation3 + $0x1e0] sm:$0xff]  }
 0x114   : > { %v661_v39 = vadd.f32 %v653_v33, %v652_v25  ;;  %v662_v41 = vadd.f32 %v654_v34, %v653_v33  ;;  %v3365_v43 = vld [vmem:[#allocation2 + $0x63] sm:$0xff] }
 0x115   : > { %v847_v44 = vpack.c.bf16 %v626_v37, %v625_v36  ;;  %v619_v47 = vmul.f32 0.5, %v3365_v43  ;;  %v3375_v54 = vld [vmem:[#allocation2 + $0x61] sm:$0xff] }
 0x116   : > { %v850_v45 = vpack.c.bf16 %v661_v39, %v660_v38  ;;  %v863_v56 = vpack.c.bf16 %v663_v49, %v662_v41  ;;  %v656_v1 = vmul.f32 0.5, %v3375_v54  ;;  %v3389_v25 = vld [vmem:[#allocation2 + $0x83] sm:$0xff]  ;;  %v862_v30 = vpack.c.bf16 %v3375_v54, %v3350_v27  ;;  %v3394_v33 = vld [vmem:[#allocation2 + $0x91] sm:$0xff] }
 0x117   : > { %1759 = vmatmul.mubr.bf16.vlgmr.msra.gmra.mxu1 %v847_v44  ;;  %v628_v61 = vadd.f32 %v619_v47, %v618_v53  ;;  %v621_v32 = vmul.f32 0.5, %v3389_v25  ;;  %v3069_v36 = vld [vmem:[#allocation3 + $0x120] sm:$0xff]   ;;  %v659_v44 = vmul.f32 0.5, %v3394_v33 }
 0x118   : > { %1823 = vmatprep.mubr.bf16.mxu0 %v850_v45  ;;  %2719 = vmatpush3.bf16.msra.mxu1 %v3057_v40  ;;  %v3378_v58 = vld [vmem:[#allocation2 + $0x71] sm:$0xff]  ;;  %v664_v20 = vadd.f32 %v656_v1, %v655_v35  ;;  %v3397_v39 = vld [vmem:[#allocation2 + $0x81] sm:$0xff] }
 0x119   : > { %1766 = vmatprep.mubr.bf16.mxu1 %v3370_v48  ;;  %1824 = vmatmul.mubr.bf16.vlgmr.msra.gmra.mxu0 %v849_v51  ;;  %v657_v62 = vmul.f32 0.5, %v3378_v58  ;;  %v3382_v2 = vld [vmem:[#allocation2 + $0x73] sm:$0xff]  ;;  %v860_v10 = vpack.c.bf16 %v628_v61, %v627_v4  ;;  %v3071_v40 = vld [vmem:[#allocation3 + $0x1a0] sm:$0xff]   ;;  %v658_v41 = vmul.f32 0.5, %v3397_v39  ;;  %v708_v4 = vmul.f32 0.33333334, %v3348_v26 }
 0x11a   : > { %2720 = vmatprep.subr.bf16.mxu1 %v3060_v46  ;;  %1831 = vmatprep.mubr.bf16.mxu0 %v863_v56  ;;  %v620_v15 = vmul.f32 0.5, %v3382_v2  ;;  %v3072_v35 = vld [vmem:[#allocation3 + $0x158] sm:$0xff]   ;;  %v3403_v46 = vld [vmem:[#allocation2 + $0xa3] sm:$0xff]  ;;  %v3076_v56 = vld [vmem:[#allocation3 + $0x150] sm:$0xff]  }
 0x11b   : > { %2759 = vmatpush3.bf16.msra.mxu0 %v3059_v50  ;;  %v665_v9 = vadd.f32 %v657_v62, %v656_v1  ;;  %v3401_v45 = vld [vmem:[#allocation2 + $0x93] sm:$0xff]  ;;  %v3405_v49 = vld [vmem:[#allocation2 + $0xa2] sm:$0xff]  ;;  %v666_v51 = vadd.f32 %v658_v41, %v657_v62 }
 0x11c   : > { %2760 = vmatprep.subr.bf16.mxu0 %v3062_v52  ;;  %2721 = vmatpush3.bf16.msra.mxu1 %v3061_v57  ;;  %v629_v37 = vadd.f32 %v620_v15, %v619_v47  ;;  %v630_v38 = vadd.f32 %v621_v32, %v620_v15  ;;  %v3074_v50 = vld [vmem:[#allocation3 + $0x1d8] sm:$0xff]   ;;  %v709_v52 = vmul.f32 0.33333334, %v3350_v27  ;;  %v622_v57 = vmul.f32 0.5, %v3401_v45  ;;  %v3078_v62 = vld [vmem:[#allocation3 + $0x1d0] sm:$0xff]   ;;  %v3080_v26 = vld [vmem:[#allocation3 + $0x148] sm:$0xff]  }
 0x11d   : > { %2722 = vmatprep.subr.bf16.mxu1 %v3064_v60  ;;  %v875_v34 = vpack.c.bf16 %v665_v9, %v664_v20  ;;  %v3073_v47 = vld [vmem:[#allocation3 + $0x118] sm:$0xff]   ;;  %v624_v60 = vmul.f32 0.5, %v3403_v46  ;;  %v884_v61 = vpack.c.bf16 %v3405_v49, %v3337_v19  ;;  %v874_v27 = vpack.c.bf16 %v3397_v39, %v3378_v58 }
 0x11e   : > { %v872_v53 = vpack.c.bf16 %v630_v38, %v629_v37  ;;  %v3075_v1 = vld [vmem:[#allocation3 + $0x198] sm:$0xff]   ;;  %v631_v20 = vadd.f32 %v622_v57, %v621_v32  ;;  %v3424_v37 = vld [vmem:[#allocation2 + $0xa1] sm:$0xff] }
 0x11f   : > { %2761 = vmatpush3.bf16.msra.mxu0 %v3063_v0  ;;  %1767 = vmatmul.mubr.bf16.gmra.mxu1 %v860_v10  ;;  %v667_v0 = vadd.f32 %v659_v44, %v658_v41  ;;  %v3077_v10 = vld [vmem:[#allocation3 + $0x110] sm:$0xff]   ;;  %v3081_v32 = vld [vmem:[#allocation3 + $0x108] sm:$0xff]   ;;  %v734_v44 = vmul.f32 0.33333334, %v3341_v22 }
 0x120   : > { %2762 = vmatprep.subr.bf16.mxu0 %v3066_v5  ;;  %2723 = vmatpush3.bf16.msra.mxu1 %v3065_v7  ;;  %v718_v5 = vmul.f32 0.33333334, %v3312_v63  ;;  %v717_v7 = vmul.f32 0.33333334, %v3306_v55  ;;  %v3417_v15 = vld [vmem:[#allocation2 + $0x34] sm:$0xff]  ;;  %v3130_v63 = vld [vmem:[%s3693_s3 + $0x28] sm:$0xff]  }
 0x121   : > { %1774 = vmatprep.mubr.bf16.mxu1 %v3387_v16  ;;  %1832 = vmatmul.mubr.bf16.gmra.mxu0 %v862_v30  ;;  %v886_v9 = vpack.c.bf16 %v667_v0, %v666_v51  ;;  %v3079_v30 = vld [vmem:[#allocation3 + $0x190] sm:$0xff]   ;;  %v680_v41 = vmul.f32 0.33333334, %v3417_v15  ;;  %v711_v51 = vmul.f32 0.33333334, %v3378_v58  ;;  %v3083_v0 = vld [vmem:[#allocation3 + $0x188] sm:$0xff]  }
 0x122   : > { %2724 = vmatprep.subr.bf16.mxu1 %v3068_v11  ;;  %1839 = vmatprep.mubr.bf16.mxu0 %v875_v34  ;;  %v726_v11 = vadd.f32 %v718_v5, %v709_v52  ;;  %v735_v34 = vmul.f32 0.33333334, %v3363_v42  ;;  %v3426_v38 = vld [vmem:[#allocation2 + $0x13] sm:$0xff]  ;;  %v710_v52 = vmul.f32 0.33333334, %v3375_v54  ;;  %v885_v5 = vpack.c.bf16 %v3424_v37, %v3394_v33 }
 0x123   : > { %2763 = vmatpush3.bf16.msra.mxu0 %v3067_v24  ;;  %v632_v24 = vadd.f32 %v624_v60, %v622_v57  ;;  %v720_v60 = vmul.f32 0.33333334, %v3344_v23  ;;  %v813_v58 = vmul.f32 0.33333334, %v3309_v59  ;;  %v719_v54 = vmul.f32 0.33333334, %v3329_v14 }
 0x124   : > { %2764 = vmatprep.subr.bf16.mxu0 %v3070_v31  ;;  %2725 = vmatpush3.bf16.msra.mxu1 %v3069_v36  ;;  %v725_v31 = vadd.f32 %v717_v7, %v708_v4  ;;  %v3420_v36 = vld [vmem:[#allocation2 + $0x24] sm:$0xff]  ;;  %v3439_v4 = vld [vmem:[#allocation2 + $0x54] sm:$0xff] }
 0x125   : > { %2726 = vmatprep.subr.bf16.mxu1 %v3072_v35  ;;  %v3422_v35 = vld [vmem:[#allocation2 + $0x44] sm:$0xff]  ;;  %v3129_v55 = vld [vmem:[%s3693_s3 + $0x30] sm:$0xff]  }
 0x126   : > { %v3434_v57 = vmul.f32 0.33333334, %v3422_v35 }
 0x127   : > { %2765 = vmatpush3.bf16.msra.mxu0 %v3071_v40  ;;  %1775 = vmatmul.mubr.bf16.gmra.mxu1 %v872_v53  ;;  %v3082_v40 = vld [vmem:[#allocation3 + $0x1c8] sm:$0xff]   ;;  %v883_v53 = vpack.c.bf16 %v632_v24, %v631_v20  ;;  %v3087_v20 = vld [vmem:[#allocation3 + $0x180] sm:$0xff]   ;;  %v728_v24 = vadd.f32 %v720_v60, %v711_v51  ;;  %v823_v60 = vmul.f32 0.33333334, %v3352_v28 }
 0x128   : > { %2766 = vmatprep.subr.bf16.mxu0 %v3074_v50  ;;  %2727 = vmatpush3.bf16.msra.mxu1 %v3073_v47  ;;  %v743_v50 = vadd.f32 %v735_v34, %v726_v11  ;;  %v3084_v47 = vld [vmem:[#allocation3 + $0x140] sm:$0xff]   ;;  %v690_v7 = vadd.f32 %v3434_v57, %v680_v41  ;;  %v3453_v34 = vmul.f32 0.33333334, %v3439_v4 }
 0x129   : > { %1782 = vmatprep.mubr.bf16.mxu1 %v884_v61  ;;  %1840 = vmatmul.mubr.bf16.gmra.mxu0 %v874_v27  ;;  %v852_v61 = vpack.c.bf16 %v3339_v21, %v3426_v38  ;;  %v3086_v27 = vld [vmem:[#allocation3 + $0x1c0] sm:$0xff]  }
 0x12a   : > { %2728 = vmatprep.subr.bf16.mxu1 %v3076_v56  ;;  %1847 = vmatprep.mubr.bf16.mxu0 %v886_v9  ;;  %v679_v56 = vmul.f32 0.33333334, %v3420_v36  ;;  %v814_v9 = vmul.f32 0.33333334, %v3315_v3  ;;  %v3131_v3 = vld [vmem:[%s3693_s3 + $0x20] sm:$0xff]  }
 0x12b   : > { %2767 = vmatpush3.bf16.msra.mxu0 %v3075_v1  ;;  %v742_v1 = vadd.f32 %v734_v44, %v725_v31  ;;  %v3088_v31 = vld [vmem:[#allocation3 + $0x278] sm:$0xff]   ;;  %v736_v44 = vmul.f32 0.33333334, %v3365_v43 }
 0x12c   : > { %2768 = vmatprep.subr.bf16.mxu0 %v3078_v62  ;;  %2729 = vmatpush3.bf16.msra.mxu1 %v3077_v10  ;;  %v689_v62 = vadd.f32 %v680_v41, %v679_v56  ;;  %v3447_v10 = vld [vmem:[#allocation2 + $0x12] sm:$0xff]  ;;  %v3455_v41 = vld [vmem:[#allocation2 + $0x64] sm:$0xff] }
 0x12d   : > { %2730 = vmatprep.subr.bf16.mxu1 %v3080_v26  ;;  %v3449_v11 = vpack.c.bf16 %v743_v50, %v742_v1  ;;  %v3085_v26 = vld [vmem:[#allocation3 + $0x100] sm:$0xff]   ;;  %v737_v50 = vmul.f32 0.33333334, %v3382_v2  ;;  %v713_v1 = vmul.f32 0.33333334, %v3394_v33  ;;  %v864_v33 = vpack.c.bf16 %v3341_v22, %v3352_v28  ;;  %v3093_v28 = vld [vmem:[#allocation3 + $0x230] sm:$0xff]  }
 0x12f   : > { %2769 = vmatpush3.bf16.msra.mxu0 %v3079_v30  ;;  %1783 = vmatmul.mubr.bf16.gmra.mxu1 %v883_v53  ;;  %v808_v30 = vmul.f32 0.33333334, %v3334_v18  ;;  %v822_v18 = vmul.f32 0.33333334, %v3339_v21  ;;  %v700_v53 = vadd.f32 %v690_v7, %v3453_v34  ;;  %v851_v21 = vpack.c.bf16 %v3309_v59, %v3447_v10  ;;  %v3128_v59 = vld [vmem:[%s3693_s3 + $0x38] sm:$0xff]  }
 0x130   : > { %2770 = vmatprep.subr.bf16.mxu0 %v3082_v40  ;;  %2731 = vmatpush3.bf16.msra.mxu1 %v3081_v32  ;;  %v727_v40 = vadd.f32 %v719_v54, %v710_v52  ;;  %v809_v32 = vmul.f32 0.33333334, %v3354_v29  ;;  %v3090_v52 = vld [vmem:[#allocation3 + $0x2f8] sm:$0xff]   ;;  %v722_v7 = vmul.f32 0.33333334, %v3337_v19 }
 0x131   : > { %1888 = vmatprep.mubr.bf16.mxu1 %v852_v61  ;;  %1848 = vmatmul.mubr.bf16.gmra.mxu0 %v885_v5  ;;  %v817_v51 = vadd.f32 %v813_v58, %v808_v30  ;;  %v3089_v29 = vld [vmem:[#allocation3 + $0x238] sm:$0xff]   ;;  %v745_v61 = vadd.f32 %v737_v50, %v728_v24  ;;  %v3092_v5 = vld [vmem:[#allocation3 + $0x270] sm:$0xff]  }
 0x132   : > { %2732 = vmatprep.subr.bf16.mxu1 %v3084_v47  ;;  %1953 = vmatprep.mubr.bf16.mxu0 %v3449_v11  ;;  %v699_v47 = vadd.f32 %v689_v62, %v3434_v57  ;;  %v818_v56 = vadd.f32 %v814_v9, %v809_v32  ;;  %v3091_v58 = vld [vmem:[#allocation3 + $0x2b8] sm:$0xff]   ;;  %v712_v9 = vmul.f32 0.33333334, %v3397_v39  ;;  %v3094_v50 = vld [vmem:[#allocation3 + $0x2f0] sm:$0xff]   ;;  %v721_v39 = vmul.f32 0.33333334, %v3320_v8 }
 0x133   : > { %2771 = vmatpush3.bf16.msra.mxu0 %v3083_v0  ;;  %v3465_v0 = vld [vmem:[#allocation2 + $0x74] sm:$0xff]  ;;  %v3468_v54 = vadd.f32 %v822_v18, %v817_v51 }
 0x134   : > { %2772 = vmatprep.subr.bf16.mxu0 %v3086_v27  ;;  %2733 = vmatpush3.bf16.msra.mxu1 %v3085_v26  ;;  %v3473_v27 = vmul.f32 0.33333334, %v3455_v41  ;;  %v3475_v62 = vadd.f32 %v823_v60, %v818_v56  ;;  %v744_v26 = vadd.f32 %v736_v44, %v727_v40  ;;  %v707_v24 = vld [vmem:[#allocation2 + $0xb1] sm:$0xff]  ;;  %v853_v32 = vpack.c.bf16 %v700_v53, %v699_v47 }
 0x135   : > { %2798 = vmatprep.subr.bf16.mxu1 %v3088_v31  ;;  %v716_v30 = vld [vmem:[#allocation2 + $0xb2] sm:$0xff]  ;;  %v723_v31 = vmul.f32 0.33333334, %v3405_v49  ;;  %v684_v51 = vmul.f32 0.33333334, %v3465_v0  ;;  %v730_v40 = vadd.f32 %v722_v7, %v713_v1  ;;  %v3096_v49 = vld [vmem:[#allocation3 + $0x268] sm:$0xff]   ;;  %v729_v56 = vadd.f32 %v721_v39, %v712_v9 }
 0x136   : > { %v869_v18 = vpack.c.bf16 %v3475_v62, %v3468_v54  ;;  %v3487_v22 = vpack.c.bf16 %v745_v61, %v744_v26  ;;  %v692_v44 = vadd.f32 %v3473_v27, %v3453_v34  ;;  %v715_v47 = vmul.f32 0.33333334, %v707_v24  ;;  %v3496_v61 = vld [vmem:[#allocation2 + $0x84] sm:$0xff]  ;;  %v678_v39 = vld [vmem:[#allocation2 + $0x94] sm:$0xff] }
 0x137   : > { %2773 = vmatpush3.bf16.msra.mxu0 %v3087_v20  ;;  %1889 = vmatmul.mubr.bf16.vlgmr.msra.gmra.mxu1 %v851_v21  ;;  %v714_v20 = vmul.f32 0.33333334, %v3424_v37  ;;  %v724_v53 = vmul.f32 0.33333334, %v716_v30  ;;  %v3095_v37 = vld [vmem:[#allocation3 + $0x2b0] sm:$0xff]   ;;  %v893_v1 = vpack.c.bf16 %v3337_v19, %v3320_v8  ;;  %v691_v21 = vadd.f32 %v3453_v34, %v3434_v57  ;;  %v3098_v7 = vld [vmem:[#allocation3 + $0x2e8] sm:$0xff]  }
 0x138   : > { %2838 = vmatprep.subr.bf16.mxu0 %v3090_v52  ;;  %2799 = vmatpush3.bf16.msra.mxu1 %v3089_v29  ;;  %v882_v52 = vpack.c.bf16 %v3344_v23, %v3329_v14  ;;  %v738_v60 = vmul.f32 0.33333334, %v3389_v25  ;;  %v739_v29 = vmul.f32 0.33333334, %v3401_v45  ;;  %v3100_v24 = vld [vmem:[#allocation3 + $0x260] sm:$0xff]   ;;  %v3099_v34 = vld [vmem:[#allocation3 + $0x2a8] sm:$0xff]  }
 0x139   : > { %1896 = vmatprep.mubr.bf16.mxu1 %v864_v33  ;;  %2800 = vmatprep.subr.bf16.mxu1 %v3092_v5  ;;  %v702_v5 = vadd.f32 %v692_v44, %v684_v51  ;;  %v733_v33 = vld [vmem:[#allocation2 + $0xb3] sm:$0xff]  ;;  %v701_v9 = vadd.f32 %v691_v21, %v3473_v27  ;;  %v685_v45 = vmul.f32 0.33333334, %v3496_v61  ;;  %v731_v30 = vadd.f32 %v723_v31, %v714_v20  ;;  %v3101_v31 = vld [vmem:[#allocation3 + $0x220] sm:$0xff]   ;;  %v3126_v62 = vld [vmem:[#allocation3 + $0x308] sm:$0xff]  }
 0x13a   : > { %1954 = vmatmul.mubr.bf16.vlgmr.msra.gmra.mxu0 %v853_v32  ;;  %v747_v26 = vadd.f32 %v739_v29, %v730_v40  ;;  %v740_v32 = vmul.f32 0.33333334, %v3403_v46  ;;  %v746_v57 = vadd.f32 %v738_v60, %v729_v56  ;;  %v732_v44 = vadd.f32 %v724_v53, %v715_v47  ;;  %v687_v20 = vld [vmem:[#allocation2 + $0xa4] sm:$0xff]  ;;  %v3133_v8 = vld [vmem:[%s3693_s3 + $0x10] sm:$0xff]  }
 0x13b   : > { %1961 = vmatprep.mubr.bf16.mxu0 %v3487_v22  ;;  %2839 = vmatpush3.bf16.msra.mxu0 %v3091_v58  ;;  %v3097_v58 = vld [vmem:[#allocation3 + $0x228] sm:$0xff]   ;;  %v865_v40 = vpack.c.bf16 %v702_v5, %v701_v9  ;;  %v693_v29 = vadd.f32 %v684_v51, %v3473_v27  ;;  %v694_v21 = vadd.f32 %v685_v45, %v684_v51  ;;  %v3103_v47 = vld [vmem:[#allocation3 + $0x2a0] sm:$0xff]   ;;  %v3106_v51 = vld [vmem:[#allocation3 + $0x2d8] sm:$0xff]   ;;  %v688_v5 = vmul.f32 0.33333334, %v687_v20 }
 0x13c   : > { %2840 = vmatprep.subr.bf16.mxu0 %v3094_v50  ;;  %2801 = vmatpush3.bf16.msra.mxu1 %v3093_v28  ;;  %v876_v50 = vpack.c.bf16 %v3365_v43, %v3363_v42  ;;  %v741_v28 = vmul.f32 0.33333334, %v733_v33  ;;  %v878_v46 = vpack.c.bf16 %v747_v26, %v746_v57  ;;  %v3104_v42 = vld [vmem:[#allocation3 + $0x258] sm:$0xff]   ;;  %v686_v43 = vmul.f32 0.33333334, %v678_v39  ;;  %v828_v56 = vld [vmem:[#allocation2 + $0x4] sm:$0xff] }
 0x13d   : > { %2802 = vmatprep.subr.bf16.mxu1 %v3096_v49  ;;  %v3102_v49 = vld [vmem:[#allocation3 + $0x2e0] sm:$0xff]   ;;  %v703_v60 = vadd.f32 %v693_v29, %v685_v45  ;;  %v829_v33 = vld [vmem:[#allocation2 + $0x14] sm:$0xff]  ;;  %v830_v57 = vmul.f32 0.5, %v828_v56 }
 0x13e   : > { %v749_v53 = vadd.f32 %v741_v28, %v732_v44  ;;  %v704_v27 = vadd.f32 %v694_v21, %v686_v43  ;;  %v697_v26 = vld [vmem:[#allocation2 + $0xb4] sm:$0xff]  ;;  %v695_v21 = vadd.f32 %v686_v43, %v685_v45  ;;  %v819_v20 = vld [vmem:[#allocation2 + $0x3] sm:$0xff] }
 0x13f   : > { %2841 = vmatpush3.bf16.msra.mxu0 %v3095_v37  ;;  %1897 = vmatmul.mubr.bf16.gmra.mxu1 %v3324_v12  ;;  %v778_v37 = vld [vmem:[#allocation2 + $0x20] sm:$0xff]  ;;  %v748_v12 = vadd.f32 %v740_v32, %v731_v30  ;;  %v3107_v39 = vld [vmem:[#allocation3 + $0x298] sm:$0xff]   ;;  %v3110_v29 = vld [vmem:[#allocation3 + $0x2d0] sm:$0xff]  }
 0x140   : > { %2842 = vmatprep.subr.bf16.mxu0 %v3098_v7  ;;  %2803 = vmatpush3.bf16.msra.mxu1 %v3097_v58  ;;  %v750_v7 = vld [vmem:[#allocation2 + $0x30] sm:$0xff]  ;;  %v3105_v58 = vld [vmem:[#allocation3 + $0x218] sm:$0xff]   ;;  %v3509_v9 = vmul.f32 0.33333334, %v778_v37  ;;  %v805_v30 = vld [vmem:[#allocation2 + $0x1] sm:$0xff] }
 0x141   : > { %1904 = vmatprep.mubr.bf16.mxu1 %v876_v50  ;;  %2804 = vmatprep.subr.bf16.mxu1 %v3100_v24  ;;  %v807_v24 = vmul.f32 0.33333334, %v3332_v17  ;;  %v3108_v50 = vld [vmem:[#allocation3 + $0x250] sm:$0xff]   ;;  %v810_v32 = vld [vmem:[#allocation2 + $0x2] sm:$0xff]  ;;  %v889_v44 = vpack.c.bf16 %v749_v53, %v748_v12  ;;  %v782_v28 = vmul.f32 0.33333334, %v750_v7  ;;  %v696_v17 = vadd.f32 %v688_v5, %v686_v43 }
 0x142   : > { %1962 = vmatmul.mubr.bf16.gmra.mxu0 %v865_v40  ;;  %v831_v40 = vmul.f32 0.5, %v829_v33  ;;  %v811_v37 = vmul.f32 0.33333334, %v810_v32  ;;  %v3111_v12 = vld [vmem:[#allocation3 + $0x290] sm:$0xff]   ;;  %v705_v43 = vadd.f32 %v695_v21, %v688_v5  ;;  %v3114_v53 = vld [vmem:[#allocation3 + $0x2c8] sm:$0xff]   ;;  %v3116_v32 = vld [vmem:[#allocation3 + $0x240] sm:$0xff]  }
 0x143   : > { %1969 = vmatprep.mubr.bf16.mxu0 %v878_v46  ;;  %2843 = vmatpush3.bf16.msra.mxu0 %v3099_v34  ;;  %v887_v34 = vpack.c.bf16 %v3389_v25, %v3382_v2  ;;  %v698_v46 = vmul.f32 0.33333334, %v697_v26  ;;  %v832_v2 = vmul.f32 0.5, %v3420_v36  ;;  %v806_v25 = vmul.f32 0.33333334, %v805_v30  ;;  %v3135_v14 = vld [vmem:[%s3693_s3] sm:$0xff]  }
 0x144   : > { %2844 = vmatprep.subr.bf16.mxu0 %v3102_v49  ;;  %2805 = vmatpush3.bf16.msra.mxu1 %v3101_v31  ;;  %v877_v49 = vpack.c.bf16 %v704_v27, %v703_v60  ;;  %v812_v31 = vmul.f32 0.33333334, %v3447_v10  ;;  %v798_v45 = vadd.f32 %v782_v28, %v3509_v9  ;;  %v839_v56 = vadd.f32 %v831_v40, %v830_v57  ;;  %v3113_v27 = vld [vmem:[#allocation3 + $0x208] sm:$0xff]  }
 0x145   : > { %2806 = vmatprep.subr.bf16.mxu1 %v3104_v42  ;;  %v3109_v42 = vld [vmem:[#allocation3 + $0x210] sm:$0xff]   ;;  %v706_v10 = vadd.f32 %v698_v46, %v696_v17  ;;  %v820_v60 = vmul.f32 0.33333334, %v819_v20  ;;  %v840_v36 = vadd.f32 %v832_v2, %v831_v40  ;;  %v758_v30 = vmul.f32 0.5, %v750_v7  ;;  %v753_v46 = vld [vmem:[#allocation2 + $0x60] sm:$0xff] }
 0x146   : > { %v816_v26 = vadd.f32 %v812_v31, %v807_v24  ;;  %v856_v5 = vpack.c.bf16 %v798_v45, %v3509_v9  ;;  %v833_v7 = vmul.f32 0.5, %v3417_v15  ;;  %v3120_v9 = vld [vmem:[#allocation3 + $0x338] sm:$0xff]  }
 0x147   : > { %2845 = vmatpush3.bf16.msra.mxu0 %v3103_v47  ;;  %1905 = vmatmul.mubr.bf16.gmra.mxu1 %v3370_v48  ;;  %v3112_v47 = vld [vmem:[#allocation3 + $0x248] sm:$0xff]   ;;  %v751_v48 = vld [vmem:[#allocation2 + $0x40] sm:$0xff]  ;;  %v858_v24 = vpack.c.bf16 %v840_v36, %v839_v56  ;;  %v836_v36 = vmul.f32 0.5, %v3455_v41 }
 0x148   : > { %2846 = vmatprep.subr.bf16.mxu0 %v3106_v51  ;;  %2807 = vmatpush3.bf16.msra.mxu1 %v3105_v58  ;;  %v752_v51 = vld [vmem:[#allocation2 + $0x50] sm:$0xff]  ;;  %v3518_v33 = vmul.f32 0.33333334, %v751_v48  ;;  %v815_v58 = vadd.f32 %v811_v37, %v806_v25  ;;  %v759_v40 = vmul.f32 0.5, %v751_v48  ;;  %v841_v15 = vadd.f32 %v833_v7, %v832_v2  ;;  %v3122_v2 = vld [vmem:[#allocation3 + $0x328] sm:$0xff]   ;;  %v3123_v41 = vld [vmem:[#allocation3 + $0x320] sm:$0xff]  }
 0x149   : > { %1912 = vmatprep.mubr.bf16.mxu1 %v887_v34  ;;  %2808 = vmatprep.subr.bf16.mxu1 %v3108_v50  ;;  %v821_v50 = vmul.f32 0.33333334, %v3426_v38  ;;  %v3115_v34 = vld [vmem:[#allocation3 + $0x288] sm:$0xff]   ;;  %v3117_v38 = vld [vmem:[#allocation3 + $0x200] sm:$0xff]   ;;  %v754_v25 = vld [vmem:[#allocation2 + $0x70] sm:$0xff] }
 0x14a   : > { %1970 = vmatmul.mubr.bf16.gmra.mxu0 %v877_v49  ;;  %v791_v57 = vadd.f32 %v3518_v33, %v782_v28  ;;  %v760_v49 = vmul.f32 0.5, %v752_v51  ;;  %v824_v21 = vadd.f32 %v820_v60, %v815_v58  ;;  %v768_v28 = vadd.f32 %v759_v40, %v758_v30  ;;  %v755_v58 = vld [vmem:[#allocation2 + $0x80] sm:$0xff] }
 0x14b   : > { %2847 = vmatpush3.bf16.msra.mxu0 %v3107_v39  ;;  %1977 = vmatprep.mubr.bf16.mxu0 %v889_v44  ;;  %v888_v39 = vpack.c.bf16 %v706_v10, %v705_v43  ;;  %v3118_v44 = vld [vmem:[#allocation3 + $0x2c0] sm:$0xff]   ;;  %v825_v17 = vadd.f32 %v821_v50, %v816_v26  ;;  %v799_v31 = vadd.f32 %v798_v45, %v3518_v33  ;;  %v785_v48 = vmul.f32 0.33333334, %v753_v46  ;;  %v3121_v10 = vld [vmem:[#allocation3 + $0x330] sm:$0xff]  }
 0x14c   : > { %2848 = vmatprep.subr.bf16.mxu0 %v3110_v29  ;;  %2809 = vmatpush3.bf16.msra.mxu1 %v3109_v42  ;;  %v784_v29 = vmul.f32 0.33333334, %v752_v51  ;;  %v834_v42 = vmul.f32 0.5, %v3422_v35  ;;  %v769_v37 = vadd.f32 %v760_v49, %v759_v40  ;;  %v786_v60 = vmul.f32 0.33333334, %v754_v25 }
 0x14d   : > { %2810 = vmatprep.subr.bf16.mxu1 %v3112_v47  ;;  %v761_v45 = vmul.f32 0.5, %v753_v46  ;;  %v835_v30 = vmul.f32 0.5, %v3439_v4 }
 0x14e   : > { %v800_v20 = vadd.f32 %v791_v57, %v784_v29  ;;  %v842_v47 = vadd.f32 %v834_v42, %v833_v7  ;;  %v855_v43 = vpack.c.bf16 %v769_v37, %v768_v28  ;;  %v792_v26 = vadd.f32 %v784_v29, %v3518_v33  ;;  %v756_v57 = vld [vmem:[#allocation2 + $0x90] sm:$0xff] }
 0x14f   : > { %2849 = vmatpush3.bf16.msra.mxu0 %v3111_v12  ;;  %1913 = vmatmul.mubr.bf16.gmra.mxu1 %v3387_v16  ;;  %v3119_v16 = vld [vmem:[#allocation3 + $0x280] sm:$0xff]   ;;  %v857_v12 = vpack.c.bf16 %v825_v17, %v824_v21  ;;  %v763_v21 = vmul.f32 0.5, %v755_v58  ;;  %v764_v17 = vmul.f32 0.5, %v756_v57  ;;  %v796_v4 = vmul.f32 0.33333334, %v756_v57  ;;  %v3125_v37 = vld [vmem:[#allocation3 + $0x310] sm:$0xff]  }
 0x150   : > { %2850 = vmatprep.subr.bf16.mxu0 %v3114_v53  ;;  %2811 = vmatpush3.bf16.msra.mxu1 %v3113_v27  ;;  %v762_v53 = vmul.f32 0.5, %v754_v25  ;;  %v868_v56 = vpack.c.bf16 %v800_v20, %v799_v31  ;;  %v870_v35 = vpack.c.bf16 %v842_v47, %v841_v15  ;;  %v793_v27 = vadd.f32 %v785_v48, %v784_v29  ;;  %v3124_v29 = vld [vmem:[#allocation3 + $0x318] sm:$0xff]  }
 0x151   : > { %2018 = vmatprep.mubr.bf16.mxu1 %v856_v5  ;;  %2812 = vmatprep.subr.bf16.mxu1 %v3116_v32  ;;  %v770_v32 = vadd.f32 %v761_v45, %v760_v49  ;;  %v801_v5 = vadd.f32 %v792_v26, %v785_v48  ;;  %v837_v49 = vmul.f32 0.5, %v3465_v0  ;;  %v773_v31 = vadd.f32 %v764_v17, %v763_v21  ;;  %v3140_v0 = vld [vmem:[#allocation2] sm:$0xff] }
 0x152   : > { %1978 = vmatmul.mubr.bf16.gmra.mxu0 %v888_v39  ;;  %v771_v51 = vadd.f32 %v762_v53, %v761_v45  ;;  %v802_v50 = vadd.f32 %v793_v27, %v786_v60  ;;  %v787_v39 = vmul.f32 0.33333334, %v755_v58  ;;  %v765_v15 = vmul.f32 0.5, %v3140_v0 }
 0x153   : > { %2851 = vmatpush3.bf16.msra.mxu0 %v3115_v34  ;;  %2083 = vmatprep.mubr.bf16.mxu0 %v858_v24  ;;  %v844_v34 = vadd.f32 %v836_v36, %v835_v30  ;;  %v843_v24 = vadd.f32 %v835_v30, %v834_v42  ;;  %v845_v20 = vadd.f32 %v837_v49, %v836_v36 }
 0x154   : > { %2852 = vmatprep.subr.bf16.mxu0 %v3118_v44  ;;  %2813 = vmatpush3.bf16.msra.mxu1 %v3117_v38  ;;  %v867_v44 = vpack.c.bf16 %v771_v51, %v770_v32  ;;  %v880_v40 = vpack.c.bf16 %v802_v50, %v801_v5  ;;  %v794_v38 = vadd.f32 %v786_v60, %v785_v48 }
 0x155   : > { %2926 = vmatprep.subr.bf16.mxu1 %v3120_v9  ;;  %v795_v7 = vadd.f32 %v787_v39, %v786_v60  ;;  %v881_v33 = vpack.c.bf16 %v844_v34, %v843_v24 }
 0x156   : > { %v803_v28 = vadd.f32 %v794_v38, %v787_v39 }
 0x157   : > { %2853 = vmatpush3.bf16.msra.mxu0 %v3119_v16  ;;  %2019 = vmatmul.mubr.bf16.vlgmr.msra.gmra.mxu1 %v855_v43  ;;  %v804_v46 = vadd.f32 %v796_v4, %v795_v7  ;;  %v838_v16 = vmul.f32 0.5, %v3496_v61  ;;  %v775_v61 = vadd.f32 %v765_v15, %v765_v15 }
 0x158   : > { %2927 = vmatpush3.bf16.msra.mxu1 %v3120_v9  ;;  %2026 = vmatprep.mubr.bf16.mxu1 %v868_v56  ;;  %v772_v9 = vadd.f32 %v763_v21, %v762_v53 }
 0x159   : > { %2928 = vmatprep.subr.bf16.mxu1 %v3121_v10  ;;  %v846_v42 = vadd.f32 %v838_v16, %v837_v49  ;;  %v891_v47 = vpack.c.bf16 %v804_v46, %v803_v28  ;;  %2950 = vmatprep.subr.bf16.mxu0 %v3128_v59 }
 0x15a   : > { %2084 = vmatmul.mubr.bf16.vlgmr.msra.gmra.mxu0 %v857_v12  ;;  %v879_v25 = vpack.c.bf16 %v773_v31, %v772_v9  ;;  %v3127_v12 = vld [vmem:[#allocation3 + $0x300] sm:$0xff]  }
 0x15b   : > { %2091 = vmatprep.mubr.bf16.mxu0 %v870_v35  ;;  %v892_v54 = vpack.c.bf16 %v846_v42, %v845_v20  ;;  %2951 = vmatpush3.bf16.msra.mxu0 %v3128_v59 }
 0x15c   : > { %2929 = vmatpush3.bf16.msra.mxu1 %v3121_v10  ;;  %2952 = vmatprep.subr.bf16.mxu0 %v3129_v55 }
 0x15d   : > { %2930 = vmatprep.subr.bf16.mxu1 %v3122_v2 }
 0x15f   : > { %2027 = vmatmul.mubr.bf16.gmra.mxu1 %v867_v44  ;;  %2953 = vmatpush3.bf16.msra.mxu0 %v3129_v55 }
 0x160   : > { %2931 = vmatpush3.bf16.msra.mxu1 %v3122_v2  ;;  %2034 = vmatprep.mubr.bf16.mxu1 %v880_v40 }
 0x161   : > { %2932 = vmatprep.subr.bf16.mxu1 %v3123_v41  ;;  %2954 = vmatprep.subr.bf16.mxu0 %v3130_v63 }
 0x162   : > { %2092 = vmatmul.mubr.bf16.gmra.mxu0 %v869_v18  ;;  %v774_v18 = vadd.f32 %v765_v15, %v764_v17 }
 0x163   : > { %2099 = vmatprep.mubr.bf16.mxu0 %v881_v33  ;;  %2955 = vmatpush3.bf16.msra.mxu0 %v3130_v63 }
 0x164   : > { %2933 = vmatpush3.bf16.msra.mxu1 %v3123_v41  ;;  %v890_v48 = vpack.c.bf16 %v775_v61, %v774_v18  ;;  %2956 = vmatprep.subr.bf16.mxu0 %v3131_v3 }
 0x165   : > { %2934 = vmatprep.subr.bf16.mxu1 %v3124_v29 }
 0x167   : > { %2035 = vmatmul.mubr.bf16.gmra.mxu1 %v879_v25  ;;  %2957 = vmatpush3.bf16.msra.mxu0 %v3131_v3 }
 0x168   : > { %2935 = vmatpush3.bf16.msra.mxu1 %v3124_v29  ;;  %2042 = vmatprep.mubr.bf16.mxu1 %v891_v47 }
 0x169   : > { %2936 = vmatprep.subr.bf16.mxu1 %v3125_v37 }
 0x16a   : > { %2100 = vmatmul.mubr.bf16.gmra.mxu0 %v3449_v11 }
 0x16b   : > { %2107 = vmatprep.mubr.bf16.mxu0 %v892_v54 }
 0x16c   : > { %2937 = vmatpush3.bf16.msra.mxu1 %v3125_v37 }
 0x16d   : > { %2938 = vmatprep.subr.bf16.mxu1 %v3126_v62 }
 0x16f   : > { %2043 = vmatmul.mubr.bf16.gmra.mxu1 %v890_v48 }
 0x170   : > { %2939 = vmatpush3.bf16.msra.mxu1 %v3126_v62  ;;  %2942 = vmatprep.mubr.bf16.mxu1 %v859_v13  ;;  %v3134_v13 = vld [vmem:[%s3693_s3 + $0x8] sm:$0xff]  }
 0x171   : > { %2940 = vmatprep.subr.bf16.mxu1 %v3127_v12 }
 0x172   : > { %2108 = vmatmul.mubr.bf16.gmra.mxu0 %v3487_v22 }
 0x174   : > { %2941 = vmatpush3.bf16.msra.mxu1 %v3127_v12 }
 0x175   : > { %2974 = vmatprep.subr.bf16.mxu1 %v3128_v59 }
 0x177   : > { %2943 = vmatmul.mubr.bf16.vlgmr.msra.gmra.mxu1 %v871_v6  ;;  %v3132_v6 = vld [vmem:[%s3693_s3 + $0x18] sm:$0xff]  }
 0x178   : > { %2946 = vmatprep.mubr.bf16.mxu1 %v882_v52  ;;  %2982 = vmatpush3.bf16.msra.mxu1 %v3128_v59 }
 0x179   : > { %2975 = vmatprep.subr.bf16.mxu1 %v3129_v55  ;;  %2958 = vmatprep.subr.bf16.mxu0 %v3132_v6 }
 0x17a   : > { %2959 = vmatpush3.bf16.msra.mxu0 %v3132_v6 }
 0x17b   : > { %2960 = vmatprep.subr.bf16.mxu0 %v3133_v8 }
 0x17c   : > { %2983 = vmatpush3.bf16.msra.mxu1 %v3129_v55 }
 0x17d   : > { %2976 = vmatprep.subr.bf16.mxu1 %v3130_v63 }
 0x17e   : > { %2961 = vmatpush3.bf16.msra.mxu0 %v3133_v8 }
 0x17f   : > { %2947 = vmatmul.mubr.bf16.gmra.mxu1 %v893_v1  ;;  %2962 = vmatprep.subr.bf16.mxu0 %v3134_v13 }
 0x180   : > { %2984 = vmatpush3.bf16.msra.mxu1 %v3130_v63 }
 0x181   : > { %2977 = vmatprep.subr.bf16.mxu1 %v3131_v3 }
 0x182   : > { %2963 = vmatpush3.bf16.msra.mxu0 %v3134_v13 }
 0x183   : > { %2964 = vmatprep.subr.bf16.mxu0 %v3135_v14 }
 0x184   : > { %2985 = vmatpush3.bf16.msra.mxu1 %v3131_v3 }
 0x185   : > { %2978 = vmatprep.subr.bf16.mxu1 %v3132_v6 }
 0x186   : > { %2965 = vmatpush3.bf16.msra.mxu0 %v3135_v14 }
 0x188   : > { %2986 = vmatpush3.bf16.msra.mxu1 %v3132_v6 }
 0x189   : > { %2979 = vmatprep.subr.bf16.mxu1 %v3133_v8 }
 0x18c   : > { %2987 = vmatpush3.bf16.msra.mxu1 %v3133_v8 }
 0x18d   : > { %2980 = vmatprep.subr.bf16.mxu1 %v3134_v13 }
 0x190   : > { %2988 = vmatpush3.bf16.msra.mxu1 %v3134_v13 }
 0x191   : > { %2981 = vmatprep.subr.bf16.mxu1 %v3135_v14 }
 0x194   : > { %2989 = vmatpush3.bf16.msra.mxu1 %v3135_v14 }
 0x1d7   : > { %v2654_v19 = vpop.f32.mrf.mxu1 }
 0x1d9   : > { %v2694_v23 = vpop.f32.mrf.mxu0  ;;  %v2655_v11 = vpop.f32.mrf.mxu1 }
 0x1da   : > { %v2656_v22 = vadd.f32 %v2655_v11, %v2654_v19 }
 0x1db   : > { %v2695_v52 = vpop.f32.mrf.mxu0  ;;  %v2657_v1 = vpop.f32.mrf.mxu1 }
 0x1dc   : > { %v2696_v43 = vadd.f32 %v2695_v52, %v2694_v23 }
 0x1dd   : > { %v2697_v10 = vpop.f32.mrf.mxu0  ;;  %v2658_v53 = vpop.f32.mrf.mxu1 }
 0x1de   : > { %v3573_v56 = vadd.f32 %v2696_v43, %v2656_v22  ;;  %v2659_v60 = vadd.f32 %v2658_v53, %v2657_v1 }
 0x1df   : > { %v2698_v45 = vpop.f32.mrf.mxu0  ;;  %v2660_v35 = vpop.f32.mrf.mxu1 }
 0x1e0   : > { %v2699_v27 = vadd.f32 %v2698_v45, %v2697_v10 }
 0x1e1   : > { %v2700_v36 = vpop.f32.mrf.mxu0  ;;  %v2661_v2 = vpop.f32.mrf.mxu1 }
 0x1e2   : > { %v3575_v51 = vadd.f32 %v2699_v27, %v2659_v60  ;;  %v2662_v58 = vadd.f32 %v2661_v2, %v2660_v35 }
 0x1e3   : > { %v2701_v26 = vpop.f32.mrf.mxu0  ;;  %v2663_v50 = vpop.f32.mrf.mxu1 }
 0x1e4   : > { %v2702_v30 = vadd.f32 %v2701_v26, %v2700_v36 }
 0x1e5   : > { %v2703_v32 = vpop.f32.mrf.mxu0  ;;  %v2664_v5 = vpop.f32.mrf.mxu1 }
 0x1e6   : > { %v3577_v34 = vadd.f32 %v2702_v30, %v2662_v58  ;;  %v2665_v57 = vadd.f32 %v2664_v5, %v2663_v50 }
 0x1e7   : > { %v2704_v39 = vpop.f32.mrf.mxu0  ;;  %v2666_v44 = vpop.f32.mrf.mxu1 }
 0x1e8   : > { %v2705_v41 = vadd.f32 %v2704_v39, %v2703_v32 }
 0x1e9   : > { %v2706_v40 = vpop.f32.mrf.mxu0  ;;  %v2667_v24 = vpop.f32.mrf.mxu1 }
 0x1ea   : > { %v3579_v38 = vadd.f32 %v2705_v41, %v2665_v57  ;;  %v2668_v7 = vadd.f32 %v2667_v24, %v2666_v44 }
 0x1eb   : > { %v2707_v21 = vpop.f32.mrf.mxu0  ;;  %v2669_v17 = vpop.f32.mrf.mxu1 }
 0x1ec   : > { %v2708_v33 = vadd.f32 %v2707_v21, %v2706_v40 }
 0x1ed   : > { %v2709_v4 = vpop.f32.mrf.mxu0  ;;  %v2670_v49 = vpop.f32.mrf.mxu1 }
 0x1ee   : > { %v3581_v29 = vadd.f32 %v2708_v33, %v2668_v7  ;;  %v2671_v9 = vadd.f32 %v2670_v49, %v2669_v17 }
 0x1ef   : > { %v2710_v28 = vpop.f32.mrf.mxu0  ;;  %v2672_v46 = vpop.f32.mrf.mxu1 }
 0x1f0   : > { %v2711_v16 = vadd.f32 %v2710_v28, %v2709_v4 }
 0x1f1   : > { %v3583_v31 = vpop.f32.mrf.mxu0  ;;  %v2673_v20 = vpop.f32.mrf.mxu1 }
 0x1f2   : > { %v3585_v42 = vadd.f32 %v2711_v16, %v2671_v9  ;;  %v3587_v25 = vadd.f32 %v2673_v20, %v2672_v46 }
 0x1f3   : > { %v2713_v37 = vpop.f32.mrf.mxu0  ;;  %v2675_v0 = vpop.f32.mrf.mxu1 }
 0x1f4   : > { %3702 = vst [vmem:[#allocation6_spill] sm:$0xff] %v3585_v42 }
 0x1f5   : > { %v3589_v15 = vpop.f32.mrf.mxu0  ;;  %v2676_v47 = vpop.f32.mrf.mxu1 }
 0x1f6   : > { %v3591_v54 = vadd.f32 %v2676_v47, %v2675_v0 }
 0x1f7   : > { %v3593_v62 = vpop.f32.mrf.mxu0  ;;  %v2734_v18 = vpop.f32.mrf.mxu1 }
 0x1f8   : > { %3703 = vst [vmem:[#allocation7_spill] sm:$0xff] %v3591_v54 }
 0x1f9   : > { %v2735_v48 = vpop.f32.mrf.mxu1 }
 0x1fa   : > { %v2774_v61 = vpop.f32.mrf.mxu0  ;;  %v2736_v20 = vadd.f32 %v2735_v48, %v2734_v18 }
 0x1fb   : > { %v2737_v59 = vpop.f32.mrf.mxu1 }
 0x1fc   : > { %v2775_v12 = vpop.f32.mrf.mxu0 }
 0x1fd   : > { %v2738_v63 = vpop.f32.mrf.mxu1  ;;  %v2776_v42 = vadd.f32 %v2775_v12, %v2774_v61 }
 0x1fe   : > { %v3595_v55 = vpop.f32.mrf.mxu0 }
 0x1ff   : > { %v2740_v6 = vpop.f32.mrf.mxu1 }
 0x200   : > { %v3597_v3 = vpop.f32.mrf.mxu0 }
 0x201   : > { %v2741_v13 = vpop.f32.mrf.mxu1 }
 0x202   : > { %v2780_v8 = vpop.f32.mrf.mxu0  ;;  %v2742_v0 = vadd.f32 %v2741_v13, %v2740_v6 }
 0x203   : > { %v2743_v19 = vpop.f32.mrf.mxu1 }
 0x204   : > { %v2781_v14 = vpop.f32.mrf.mxu0  ;;  %v1899_v54 = vadd.f32 %v2742_v0, %v3577_v34 }
 0x205   : > { %v2744_v11 = vpop.f32.mrf.mxu1 }
 0x206   : > { %v2783_v23 = vpop.f32.mrf.mxu0  ;;  %v2745_v47 = vadd.f32 %v2744_v11, %v2743_v19 }
 0x207   : > { %v2746_v52 = vpop.f32.mrf.mxu1 }
 0x208   : > { %v2784_v22 = vpop.f32.mrf.mxu0 }
 0x209   : > { %v2747_v43 = vpop.f32.mrf.mxu1  ;;  %v2785_v18 = vadd.f32 %v2784_v22, %v2783_v23 }
 0x20a   : > { %v3599_v1 = vpop.f32.mrf.mxu0  ;;  %v2748_v13 = vadd.f32 %v2747_v43, %v2746_v52 }
 0x20b   : > { %v3603_v53 = vpop.f32.mrf.mxu1 }
 0x20c   : > { %v3601_v10 = vpop.f32.mrf.mxu0  ;;  %3704 = vst [vmem:[#allocation8_spill] sm:$0xff] %v3603_v53  ;;  %v1902_v53 = vadd.f32 %v2745_v47, %v3579_v38 }
 0x20d   : > { %v3607_v45 = vpop.f32.mrf.mxu1  ;;  %v2788_v22 = vadd.f32 %v3601_v10, %v3599_v1 }
 0x20e   : > { %v3605_v60 = vpop.f32.mrf.mxu0  ;;  %3706 = vst [vmem:[#allocation10_spill] sm:$0xff] %v3607_v45  ;;  %v2739_v45 = vadd.f32 %v2738_v63, %v2737_v59  ;;  %v2779_v59 = vadd.f32 %v3597_v3, %v3595_v55  ;;  %v1967_v63 = vadd.f32 %v2785_v18, %v1902_v53 }
 0x20f   : > { %3705 = vst [vmem:[#allocation9_spill] sm:$0xff] %v3605_v60  ;;  %v2752_v27 = vpop.f32.mrf.mxu1 }
 0x210   : > { %v3609_v35 = vpop.f32.mrf.mxu0  ;;  %v1894_v38 = vadd.f32 %v2739_v45, %v3575_v51 }
 0x211   : > { %3707 = vst [vmem:[#allocation11_spill] sm:$0xff] %v3609_v35  ;;  %v2753_v2 = vpop.f32.mrf.mxu1 }
 0x212   : > { %v3611_v36 = vpop.f32.mrf.mxu0  ;;  %v1959_v10 = vadd.f32 %v2779_v59, %v1894_v38 }
 0x213   : > { %3708 = vst [vmem:[#allocation12_spill] sm:$0xff] %v3611_v36  ;;  %v2755_v26 = vpop.f32.mrf.mxu1  ;;  %v2782_v36 = vadd.f32 %v2781_v14, %v2780_v8 }
 0x214   : > { %v2793_v58 = vpop.f32.mrf.mxu0 }
 0x215   : > { %v2756_v30 = vpop.f32.mrf.mxu1  ;;  %v1964_v61 = vadd.f32 %v2782_v36, %v1899_v54 }
 0x216   : > { %v3613_v50 = vpop.f32.mrf.mxu0  ;;  %v2757_v45 = vadd.f32 %v2756_v30, %v2755_v26 }
 0x217   : > { %3709 = vst [vmem:[#allocation13_spill] sm:$0xff] %v3613_v50  ;;  %v2814_v5 = vpop.f32.mrf.mxu1 }
 0x218   : > { %v3615_v32 = vpop.f32.mrf.mxu0 }
 0x219   : > { %3710 = vst [vmem:[#allocation14_spill] sm:$0xff] %v3615_v32  ;;  %v2815_v39 = vpop.f32.mrf.mxu1 }
 0x21a   : > { %v2854_v57 = vpop.f32.mrf.mxu0  ;;  %v2816_v12 = vadd.f32 %v2815_v39, %v2814_v5  ;;  %v3717_v5 = vld [vmem:[#allocation7_spill] sm:$0xff] }
 0x21b   : > { %v2817_v41 = vpop.f32.mrf.mxu1 }
 0x21c   : > { %v2855_v44 = vpop.f32.mrf.mxu0 }
 0x21d   : > { %v2818_v24 = vpop.f32.mrf.mxu1  ;;  %v2856_v3 = vadd.f32 %v2855_v44, %v2854_v57  ;;  %v2610_v44 = vld [vmem:[%s3696_s6] ss:$0 sm:$0xff] }
 0x21e   : > { %v3617_v40 = vpop.f32.mrf.mxu0  ;;  %v2819_v53 = vadd.f32 %v2818_v24, %v2817_v41  ;;  %v3723_v0 = vld [vmem:[#allocation13_spill] sm:$0xff] }
 0x21f   : > { %3711 = vst [vmem:[#allocation15_spill] sm:$0xff] %v3617_v40  ;;  %v2820_v21 = vpop.f32.mrf.mxu1  ;;  %v2714_v40 = vadd.f32 %v2713_v37, %v3583_v31  ;;  %v2754_v37 = vadd.f32 %v2753_v2, %v2752_v27  ;;  %v3716_v27 = vld [vmem:[#allocation12_spill] sm:$0xff] }
 0x220   : > { %v3619_v7 = vpop.f32.mrf.mxu0  ;;  %v2794_v51 = vadd.f32 %v2793_v58, %v3716_v27  ;;  %v3720_v58 = vld [vmem:[#allocation11_spill] sm:$0xff]  ;;  %v2024_v41 = vadd.f32 %v2819_v53, %v1959_v10  ;;  %v3724_v47 = vld [vmem:[#allocation14_spill] sm:$0xff] }
 0x221   : > { %3712 = vst [vmem:[#allocation16_spill] sm:$0xff] %v3619_v7  ;;  %v2821_v33 = vpop.f32.mrf.mxu1  ;;  %v1891_v7 = vadd.f32 %v2736_v20, %v3573_v56  ;;  %v1850_v31 = vadd.f32 %v2714_v40, %v3587_v25  ;;  %v2717_v56 = vadd.f32 %v3593_v62, %v3589_v15  ;;  %v1907_v25 = vadd.f32 %v2748_v13, %v3581_v29  ;;  %v3714_v15 = vld [vmem:[#allocation8_spill] sm:$0xff] }
 0x222   : > { %v2860_v17 = vpop.f32.mrf.mxu0  ;;  %v2822_v19 = vadd.f32 %v2821_v33, %v2820_v21  ;;  %v2797_v18 = vadd.f32 %v3724_v47, %v3723_v0 }
 0x223   : > { %v2823_v49 = vpop.f32.mrf.mxu1  ;;  %v1956_v34 = vadd.f32 %v2776_v42, %v1891_v7  ;;  %v3715_v42 = vld [vmem:[#allocation10_spill] sm:$0xff]  ;;  %v1915_v62 = vadd.f32 %v2754_v37, %v1850_v31  ;;  %v1853_v39 = vadd.f32 %v2717_v56, %v3717_v5  ;;  %v1972_v21 = vadd.f32 %v2788_v22, %v1907_v25 }
 0x224   : > { %v2861_v4 = vpop.f32.mrf.mxu0  ;;  %v2029_v52 = vadd.f32 %v2822_v19, %v1964_v61  ;;  %v2751_v54 = vadd.f32 %v3715_v42, %v3714_v15 }
 0x225   : > { %v2824_v28 = vpop.f32.mrf.mxu1  ;;  %v2862_v43 = vadd.f32 %v2861_v4, %v2860_v17  ;;  %v2021_v55 = vadd.f32 %v2816_v12, %v1956_v34  ;;  %v3718_v4 = vld [vmem:[#allocation6_spill] sm:$0xff]  ;;  %v1980_v30 = vadd.f32 %v2794_v51, %v1915_v62  ;;  %v1918_v20 = vadd.f32 %v2757_v45, %v1853_v39 }
 0x226   : > { %v2863_v9 = vpop.f32.mrf.mxu0  ;;  %v2825_v8 = vadd.f32 %v2824_v28, %v2823_v49  ;;  %v1910_v49 = vadd.f32 %v2751_v54, %v3718_v4  ;;  %v3719_v28 = vld [vmem:[#allocation9_spill] sm:$0xff]  ;;  %v3721_v24 = vld [vmem:[#allocation15_spill] sm:$0xff] }
 0x227   : > { %v2826_v16 = vpop.f32.mrf.mxu1  ;;  %v2094_v33 = vadd.f32 %v2862_v43, %v2029_v52  ;;  %v2791_v26 = vadd.f32 %v3720_v58, %v3719_v28 }
 0x228   : > { %v2864_v46 = vpop.f32.mrf.mxu0  ;;  %v2032_v29 = vadd.f32 %v2825_v8, %v1967_v63  ;;  %v2611_v8 = vld [vmem:[%s3697_s7] ss:$0 sm:$0xff] }
 0x229   : > { %v2827_v50 = vpop.f32.mrf.mxu1  ;;  %v2865_v40 = vadd.f32 %v2864_v46, %v2863_v9  ;;  %v1975_v15 = vadd.f32 %v2791_v26, %v1910_v49 }
 0x22a   : > { %v3621_v32 = vpop.f32.mrf.mxu0  ;;  %v2828_v7 = vadd.f32 %v2827_v50, %v2826_v16  ;;  %v3722_v50 = vld [vmem:[#allocation16_spill] sm:$0xff] }
 0x22b   : > { %v3624_v60 = vpop.f32.mrf.mxu1  ;;  %v2859_v9 = vadd.f32 %v3722_v50, %v3721_v24  ;;  %v2097_v37 = vadd.f32 %v2865_v40, %v2032_v29 }
 0x22c   : > { %v2867_v35 = vpop.f32.mrf.mxu0  ;;  %3713 = vst [vmem:[#allocation17_spill] sm:$0xff] %v3624_v60  ;;  %v2037_v13 = vadd.f32 %v2828_v7, %v1972_v21 }
 0x22d   : > { %v2830_v6 = vpop.f32.mrf.mxu1  ;;  %v2868_v19 = vadd.f32 %v2867_v35, %v3621_v32  ;;  %v2089_v43 = vadd.f32 %v2859_v9, %v2024_v41  ;;  %v1983_v35 = vadd.f32 %v2797_v18, %v1918_v20 }
 0x22e   : > { %v3629_v48 = vpop.f32.mrf.mxu0 }
 0x22f   : > { %v2832_v60 = vpop.f32.mrf.mxu1  ;;  %v2102_v42 = vadd.f32 %v2868_v19, %v2037_v13  ;;  %v2620_v13 = vld [vmem:[%s3698_s8] ss:$0 sm:$0xff] }
 0x230   : > { %v3632_v11 = vpop.f32.mrf.mxu0  ;;  %v2621_v19 = vld [vmem:[%s3699_s9] ss:$0 sm:$0xff] }
 0x231   : > { %v2833_v23 = vpop.f32.mrf.mxu1 }
 0x232   : > { %v2872_v14 = vpop.f32.mrf.mxu0  ;;  %v2834_v17 = vadd.f32 %v2833_v23, %v2832_v60  ;;  %v2086_v60 = vadd.f32 %v2856_v3, %v2021_v55 }
 0x233   : > { %v2835_v36 = vpop.f32.mrf.mxu1  ;;  %v3725_v38 = vld [vmem:[#allocation17_spill] sm:$0xff] }
 0x234   : > { %v2873_v2 = vpop.f32.mrf.mxu0  ;;  %v2045_v56 = vadd.f32 %v2834_v17, %v1980_v30  ;;  %v2831_v59 = vadd.f32 %v2830_v6, %v3725_v38  ;;  %v2871_v6 = vadd.f32 %v3632_v11, %v3629_v48 }
 0x235   : > { %v2836_v1 = vpop.f32.mrf.mxu1  ;;  %v2874_v34 = vadd.f32 %v2873_v2, %v2872_v14 }
 0x236   : > { %v2875_v46 = vpop.f32.mrf.mxu0  ;;  %v2837_v63 = vadd.f32 %v2836_v1, %v2835_v36  ;;  %v2040_v51 = vadd.f32 %v2831_v59, %v1975_v15 }
 0x237   : > { %v2944_v57 = vpop.f32.mrf.mxu1  ;;  %v2110_v27 = vadd.f32 %v2874_v34, %v2045_v56 }
 0x238   : > { %v2159_v16 = vadd.f32 %v2944_v57, %v2094_v33  ;;  %v2876_v25 = vpop.f32.mrf.mxu0  ;;  %v2048_v45 = vadd.f32 %v2837_v63, %v1983_v35  ;;  %v2105_v33 = vadd.f32 %v2871_v6, %v2040_v51 }
 0x239   : > { %v2150_v31 = vpop.f32.mrf.mxu1  ;;  %v2877_v36 = vadd.f32 %v2876_v25, %v2875_v46 }
 0x23a   : > { %v2190_v61 = vmul.f32 %v2610_v44, %v2159_v16  ;;  %v2151_v12 = vadd.f32 %v2150_v31, %v2086_v60  ;;  %v3141_v31 = vld [vmem:[%s3279_s12 + $0x8] sm:$0xff]  }
 0x23b   : > { %v2945_v23 = vpop.f32.mrf.mxu1  ;;  %v2113_v21 = vadd.f32 %v2877_v36, %v2048_v45  ;;  %v3144_v36 = vld [vmem:[%s3279_s12 + $0x10] sm:$0xff]  }
 0x23c   : > { %v2188_v22 = vmul.f32 %v2610_v44, %v2151_v12  ;;  %v2162_v52 = vadd.f32 %v2945_v23, %v2097_v37  ;;  %v2205_v54 = vadd.f32 %v2611_v8, %v2190_v61  ;;  %v2354_v37 = vunpack.c.l.bf16 %v3141_v31  ;;  %v3142_v61 = vld [vmem:[%s3279_s12] sm:$0xff]  }
 0x23d   : > { %v2153_v32 = vpop.f32.mrf.mxu1  ;;  %v2352_v12 = vunpack.c.l.bf16 %v3142_v61 }
 0x23e   : > { %v2191_v14 = vmul.f32 %v2610_v44, %v2162_v52  ;;  %v2154_v62 = vadd.f32 %v2153_v32, %v2089_v43  ;;  %v2203_v3 = vadd.f32 %v2611_v8, %v2188_v22  ;;  %v2213_v29 = vmax.f32 %v2205_v54, 0.0  ;;  %v3143_v54 = vld [vmem:[%s3279_s12 + $0x18] sm:$0xff]  }
 0x23f   : > { %v2948_v55 = vpop.f32.mrf.mxu1  ;;  %v2353_v52 = vunpack.c.h.bf16 %v3142_v61 }
 0x240   : > { %v2206_v53 = vadd.f32 %v2611_v8, %v2191_v14  ;;  %v2189_v2 = vmul.f32 %v2610_v44, %v2154_v62  ;;  %v2175_v5 = vadd.f32 %v2948_v55, %v2110_v27  ;;  %v2211_v4 = vmax.f32 %v2203_v3, 0.0 }
 0x241   : > { %v2166_v39 = vpop.f32.mrf.mxu1  ;;  %v2358_v14 = vunpack.c.l.bf16 %v3143_v54  ;;  %v2356_v55 = vunpack.c.l.bf16 %v3144_v36 }
 0x242   : > { %v2214_v40 = vmax.f32 %v2206_v53, 0.0  ;;  %v2204_v7 = vadd.f32 %v2611_v8, %v2189_v2  ;;  %v2167_v1 = vadd.f32 %v2166_v39, %v2102_v42  ;;  %v2194_v10 = vmul.f32 %v2610_v44, %v2175_v5 }
 0x243   : > { %v2949_v17 = vpop.f32.mrf.mxu1 }
 0x244   : > { %v2220_v49 = vpack.c.bf16 %v2214_v40, %v2213_v29  ;;  %v2212_v28 = vmax.f32 %v2204_v7, 0.0  ;;  %v2192_v48 = vmul.f32 %v2610_v44, %v2167_v1  ;;  %v2178_v11 = vadd.f32 %v2949_v17, %v2113_v21 }
 0x245   : > { %v2169_v58 = vpop.f32.mrf.mxu1  ;;  %v2209_v20 = vadd.f32 %v2611_v8, %v2194_v10  ;;  %v2359_v29 = vunpack.c.h.bf16 %v3143_v54  ;;  %v2357_v17 = vunpack.c.h.bf16 %v3144_v36 }
 0x246   : > { %v2170_v26 = vadd.f32 %v2169_v58, %v2105_v33  ;;  %v2219_v30 = vpack.c.bf16 %v2212_v28, %v2211_v4  ;;  %v2195_v57 = vmul.f32 %v2610_v44, %v2178_v11  ;;  %v2207_v41 = vadd.f32 %v2611_v8, %v2192_v48 }
 0x247   : > { %v2217_v46 = vmax.f32 %v2209_v20, 0.0 }
 0x248   : > { %v2193_v24 = vmul.f32 %v2610_v44, %v2170_v26  ;;  %2966 = vmatprep.mubr.bf16.mxu0 %v2219_v30  ;;  %v2210_v50 = vadd.f32 %v2611_v8, %v2195_v57  ;;  %v2215_v60 = vmax.f32 %v2207_v41, 0.0 }
 0x249   : > { %2967 = vmatmul.mubr.bf16.vlgmr.msra.gmra.mxu0 %v2220_v49 }
 0x24a   : > { %v2208_v9 = vadd.f32 %v2611_v8, %v2193_v24  ;;  %v2218_v16 = vmax.f32 %v2210_v50, 0.0  ;;  %v2355_v8 = vunpack.c.h.bf16 %v3141_v31 }
 0x24c   : > { %v2216_v0 = vmax.f32 %v2208_v9, 0.0  ;;  %v2222_v47 = vpack.c.bf16 %v2218_v16, %v2217_v46 }
 0x24e   : > { %v2221_v18 = vpack.c.bf16 %v2216_v0, %v2215_v60 }
 0x250   : > { %2970 = vmatprep.mubr.bf16.mxu1 %v2221_v18 }
 0x251   : > { %2971 = vmatmul.mubr.bf16.vlgmr.msra.gmra.mxu1 %v2222_v47 }
 0x309   : > { %v2968_v44 = vpop.f32.mrf.mxu0 }
 0x30a   : > { %v2369_v56 = vmul.f32 %v2968_v44, %v2620_v13 }
 0x30b   : > { %v2321_v34 = vpop.f32.mrf.mxu0 }
 0x30c   : > { %v2384_v38 = vadd.f32 %v2621_v19, %v2369_v56  ;;  %v2367_v59 = vmul.f32 %v2620_v13, %v2321_v34 }
 0x30d   : > { %v2969_v63 = vpop.f32.mrf.mxu0 }
 0x30e   : > { %v2392_v23 = vadd.f32 %v2384_v38, %v2354_v37  ;;  %v2382_v25 = vadd.f32 %v2621_v19, %v2367_v59  ;;  %v2370_v22 = vmul.f32 %v2969_v63, %v2620_v13 }
 0x30f   : > { %v2324_v43 = vpop.f32.mrf.mxu0 }
 0x310   : > { %v2400_v15 = vmax.f32 %v2392_v23, 0.0  ;;  %v2390_v35 = vadd.f32 %v2382_v25, %v2352_v12  ;;  %v2385_v32 = vadd.f32 %v2621_v19, %v2370_v22  ;;  %v2368_v42 = vmul.f32 %v2620_v13, %v2324_v43 }
 0x311   : > { %v2972_v62 = vpop.f32.mrf.mxu1 }
 0x312   : > { %2408 = vst [vmem:[%s3675_s22 + $0x10] sm:$0xff] %v2400_v15  ;;  %v2398_v27 = vmax.f32 %v2390_v35, 0.0  ;;  %v2393_v51 = vadd.f32 %v2385_v32, %v2355_v8  ;;  %v2383_v6 = vadd.f32 %v2621_v19, %v2368_v42  ;;  %v2373_v45 = vmul.f32 %v2972_v62, %v2620_v13 }
 0x313   : > { %v2337_v3 = vpop.f32.mrf.mxu1 }
 0x314   : > { %2406 = vst [vmem:[%s3675_s22] sm:$0xff] %v2398_v27  ;;  %v2401_v53 = vmax.f32 %v2393_v51, 0.0  ;;  %v2391_v2 = vadd.f32 %v2383_v6, %v2353_v52  ;;  %v2388_v5 = vadd.f32 %v2621_v19, %v2373_v45  ;;  %v2371_v39 = vmul.f32 %v2620_v13, %v2337_v3 }
 0x315   : > { %v2973_v40 = vpop.f32.mrf.mxu1 }
 0x316   : > { %2409 = vst [vmem:[%s3675_s22 + $0x18] sm:$0xff] %v2401_v53  ;;  %v2399_v7 = vmax.f32 %v2391_v2, 0.0  ;;  %v2396_v1 = vadd.f32 %v2388_v5, %v2358_v14  ;;  %v2386_v10 = vadd.f32 %v2621_v19, %v2371_v39  ;;  %v2374_v21 = vmul.f32 %v2973_v40, %v2620_v13 }
 0x317   : > { %v2340_v33 = vpop.f32.mrf.mxu1 }
 0x318   : > { %2407 = vst [vmem:[%s3675_s22 + $0x8] sm:$0xff] %v2399_v7  ;;  %v2404_v4 = vmax.f32 %v2396_v1, 0.0  ;;  %v2394_v49 = vadd.f32 %v2386_v10, %v2356_v55  ;;  %v2389_v28 = vadd.f32 %v2621_v19, %v2374_v21  ;;  %v2372_v48 = vmul.f32 %v2620_v13, %v2340_v33 }
 0x31a   : > { %2412 = vst [vmem:[%s3675_s22 + $0x30] sm:$0xff] %v2404_v4  ;;  %v2402_v11 = vmax.f32 %v2394_v49, 0.0  ;;  %v2397_v58 = vadd.f32 %v2389_v28, %v2359_v29  ;;  %v2387_v26 = vadd.f32 %v2621_v19, %v2372_v48 }
 0x31c   : > { %2410 = vst [vmem:[%s3675_s22 + $0x20] sm:$0xff] %v2402_v11  ;;  %v2405_v30 = vmax.f32 %v2397_v58, 0.0  ;;  %v2395_v20 = vadd.f32 %v2387_v26, %v2357_v17 }
 0x31e   : > { %2413 = vst [vmem:[%s3675_s22 + $0x38] sm:$0xff] %v2405_v30  ;;  %v2403_v57 = vmax.f32 %v2395_v20, 0.0 }
 0x320   : > { %2411 = vst [vmem:[%s3675_s22 + $0x28] sm:$0xff] %v2403_v57 }
 0x321 PF: > { %s21_s13 = sadd.s32 1, %s3181_s13  }
 0x322   : > { %p18_p1 = scmp.ge.s32.totalorder %s21_s13, 4  }
 0x324   :  { %20 = sbr.rel (!%p18_p1) target bundleno = 1 (0x1), region = 95 }
 0x329   :  { %2435 = vsyncpa [#allocation4], 1 }
 0x32a   :  { %2437 = vsyncpa [#allocation4 + $0x1], 1 }

</bundles_post_ra>
